<compile_context>
chip_gen: v7x
topology: tpu7x:2x2x1
jax: 0.10.0
libtpu: 0.0.40
codegen_flags: <defaults>
</compile_context>

<pallas_src>
import functools

import jax
import jax.numpy as jnp
from jax import lax
from jax.experimental import pallas as pl
from jax.experimental.pallas import tpu as pltpu


def _round_up(v, m):
    return -(-v // m) * m


# bf16 sublane packing: pad channel counts to a multiple of 16 so every im2col /
# activation sublane window is packed-tile aligned.
CPACK = 16


# ----------------------------------------------------------------------------
# Parameter init (matches weights_init: conv weights ~ N(0, 0.02), bias-free)
# ----------------------------------------------------------------------------
def init_params(key, nc, ngf, n_blocks=4):
    ks = jax.random.split(key, 2 * n_blocks + 2)

    def cw(k, cout, cin, ksz):
        return 0.02 * jax.random.normal(k, (cout, cin, ksz, ksz), dtype=jnp.float32)

    blocks = [(cw(ks[1 + 2 * b], ngf, ngf, 3), cw(ks[2 + 2 * b], ngf, ngf, 3))
              for b in range(n_blocks)]
    return {
        "conv1": cw(ks[0], ngf, nc, 3),     # [ngf, nc, 3, 3]
        "blocks": blocks,                   # 4 x ([ngf, ngf, 3, 3], [ngf, ngf, 3, 3])
        "conv2": cw(ks[-1], nc, ngf, 1),    # [nc, ngf, 1, 1]
    }


def prepare_params(params):
    """Pre-pad / pre-reshape / pre-cast conv weights ONCE into kernel layout (bf16)."""
    ngf, nc = params["conv1"].shape[0], params["conv1"].shape[1]
    cpi = _round_up(nc, CPACK)     # padded input-channel count
    cpg = _round_up(ngf, CPACK)    # padded hidden-channel count

    def prep3x3(w, cpo, cpin):
        cout, cin = w.shape[:2]
        w = jnp.transpose(w, (0, 2, 3, 1))                         # (cout, 3, 3, cin)
        w = jnp.pad(w, ((0, cpo - cout), (0, 0), (0, 0), (0, cpin - cin)))
        # tap k = kh*3 + kw owns the contiguous column block [k*cpin, (k+1)*cpin)
        return w.reshape(cpo, 9 * cpin).astype(jnp.bfloat16)

    w1 = prep3x3(params["conv1"], cpg, cpi)                        # (cpg, 9*cpi)
    wb = jnp.stack([prep3x3(w, cpg, cpg)
                    for pair in params["blocks"] for w in pair])   # (nb, cpg, 9*cpg)
    w2 = jnp.pad(params["conv2"].reshape(nc, ngf),
                 ((0, 0), (0, cpg - ngf))).astype(jnp.bfloat16)    # (nc, cpg)
    return {"w1": w1, "wb": wb, "w2": w2}


# ----------------------------------------------------------------------------
# Fused forward pass
# ----------------------------------------------------------------------------
@functools.partial(jax.jit, static_argnames=("chunk",))
def refiner_forward(x, pw, chunk=2048):
    """x: [N, nc, H, W] float32 (NCHW).  Returns [N, nc, H, W] float32."""
    N, nc, H, W = x.shape
    cpg = pw["w1"].shape[0]          # padded hidden channels
    cpi = pw["w1"].shape[1] // 9     # padded input channels
    nb = pw["wb"].shape[0]           # number of 3x3 convs inside resnet blocks (8)

    Hp, Wp = H + 2, W + 2            # zero-padded spatial extent (pad = 1)
    Lc = Hp * Wp                     # per-sample flattened padded length
    G = max(128, _round_up(Wp + 1, 128))   # lane-aligned guard >= 3x3 tap reach
    Lt = min(chunk, _round_up(Lc, 128))    # lanes per matmul chunk (mult. of 128)
    Lc_pad = _round_up(Lc, Lt)             # interior rounded up to a chunk multiple
    LG = G + Lc_pad + G
    n_chunks = Lc_pad // Lt
    im_rows = 9 * max(cpi, cpg)

    # --- glue: channel-padded, channel-major, spatially padded, guarded bf16 input
    xp = jnp.pad(x, ((0, 0), (0, cpi - nc), (1, 1), (1, 1)))       # [N, cpi, Hp, Wp]
    x_ext = jnp.pad(xp.reshape(N, cpi, Lc).astype(jnp.bfloat16),
                    ((0, 0), (0, 0), (G, LG - G - Lc)))            # [N, cpi, LG]

    # interior mask (1 inside the original HxW image, 0 on pad ring / chunk overrun)
    mask = jnp.pad(jnp.ones((H, W), jnp.float32), ((1, 1), (1, 1))).reshape(1, Lc)
    mask = jnp.pad(mask, ((0, 0), (0, Lc_pad - Lc)))               # (1, Lc_pad)

    # flat lane offsets of the nine 3x3 taps relative to the output position
    offs = tuple((kh - 1) * Wp + (kw - 1) for kh in range(3) for kw in range(3))

    def kernel(x_ref, m_ref, w1_ref, wb_ref, w2_ref, o_ref, h_ref, t_ref, im_ref):
        # Guard columns must be zero on EVERY grid step (scratch persists across
        # samples; the interior is fully rewritten, the guards never are).
        zg = jnp.zeros((cpg, G), dtype=jnp.bfloat16)
        h_ref[:, :G] = zg
        h_ref[:, G + Lc_pad:] = zg
        t_ref[:, :G] = zg
        t_ref[:, G + Lc_pad:] = zg

        def for_each_chunk(fn):
            if n_chunks == 1:
                fn(0)                                    # static slices
            else:
                def body(c, carry):
                    fn(pl.multiple_of(c * Lt, 128))
                    return carry
                lax.fori_loop(0, n_chunks, body, 0)

        def conv3x3(src_ref, dst_ref, wcat, csrc, residual):
            """dst[:, G:G+Lc_pad] = relu(conv3x3(src)) * mask  (optionally +skip, relu)."""
            kdim = 9 * csrc

            def do_chunk(pos):
                # Fused im2col: stack the nine lane-shifted taps along K, then one
                # big-K MXU matmul instead of 9 small-K dots + f32 VPU accumulation.
                for k, d in enumerate(offs):
                    im_ref[k * csrc:(k + 1) * csrc, :] = (
                        src_ref[:, pl.ds(G + pos + d, Lt)])
                out = jnp.dot(wcat, im_ref[:kdim, :],
                              preferred_element_type=jnp.float32)
                out = jnp.maximum(out, 0.0) * m_ref[:, pl.ds(pos, Lt)]
                if residual:
                    skip = dst_ref[:, pl.ds(G + pos, Lt)].astype(jnp.float32)
                    out = jnp.maximum(out + skip, 0.0)
                dst_ref[:, pl.ds(G + pos, Lt)] = out.astype(jnp.bfloat16)

            for_each_chunk(do_chunk)

        # conv1 (3x3, nc -> ngf; channel-padded) + ReLU
        conv3x3(x_ref, h_ref, w1_ref[...], cpi, residual=False)

        # 4 residual blocks: relu(conv) -> relu(conv) -> add skip -> relu
        def block(b, carry):
            conv3x3(h_ref, t_ref, wb_ref[2 * b], cpg, residual=False)
            conv3x3(t_ref, h_ref, wb_ref[2 * b + 1], cpg, residual=True)
            return carry
        lax.fori_loop(0, nb // 2, block, 0)

        # conv2 (1x1, ngf -> nc) + tanh
        w2 = w2_ref[...]

        def final(pos):
            hc = h_ref[:, pl.ds(G + pos, Lt)]
            o_ref[:, pl.ds(pos, Lt)] = jnp.tanh(
                jnp.dot(w2, hc, preferred_element_type=jnp.float32))

        for_each_chunk(final)

    # VMEM footprint (scratch + double-buffered I/O blocks + resident weights)
    scratch_bytes = 2 * (2 * cpg * LG + im_rows * Lt)
    io_bytes = 2 * (2 * cpi * LG) + 2 * 4 * Lc_pad + 2 * 4 * nc * Lc_pad
    w_bytes = 2 * 2 * (pw["w1"].size + pw["wb"].size + pw["w2"].size)
    vmem_limit = int(min(100 * 2**20,
                         max(32 * 2**20, 2 * (scratch_bytes + io_bytes + w_bytes))))

    flops = int(2 * N * Lc_pad * (9 * cpi * cpg + nb * 9 * cpg * cpg + cpg * nc))
    bytes_accessed = int(x_ext.size * 2 + mask.size * 4 + N * nc * Lc_pad * 4
                         + (pw["w1"].size + pw["wb"].size + pw["w2"].size) * 2)

    y = pl.pallas_call(
        kernel,
        out_shape=jax.ShapeDtypeStruct((N, nc, Lc_pad), jnp.float32),
        grid=(N,),
        in_specs=[
            pl.BlockSpec((None, cpi, LG), lambda n: (n, 0, 0)),      # per-sample input
            pl.BlockSpec((1, Lc_pad), lambda n: (0, 0)),             # interior mask
            pl.BlockSpec((cpg, 9 * cpi), lambda n: (0, 0)),          # conv1 weights
            pl.BlockSpec((nb, cpg, 9 * cpg), lambda n: (0, 0, 0)),   # block weights
            pl.BlockSpec((nc, cpg), lambda n: (0, 0)),               # conv2 weights
        ],
        out_specs=pl.BlockSpec((None, nc, Lc_pad), lambda n: (n, 0, 0)),
        scratch_shapes=[pltpu.VMEM((cpg, LG), jnp.bfloat16),         # h (guarded)
                        pltpu.VMEM((cpg, LG), jnp.bfloat16),         # t (guarded)
                        pltpu.VMEM((im_rows, Lt), jnp.bfloat16)],    # im2col chunk
        compiler_params=pltpu.CompilerParams(
            dimension_semantics=("parallel",),
            vmem_limit_bytes=vmem_limit),
        cost_estimate=pl.CostEstimate(flops=flops,
                                      transcendentals=int(N * nc * Lc_pad),
                                      bytes_accessed=bytes_accessed),
    )(x_ext, mask, pw["w1"], pw["wb"], pw["w2"])

    # drop chunk overrun + pad ring, back to NCHW
    return y[:, :, :Lc].reshape(N, nc, Hp, Wp)[:, :, 1:1 + H, 1:1 + W]


# ----------------------------------------------------------------------------
# Pure-JAX f32 reference (sanity check)
# ----------------------------------------------------------------------------
def refiner_reference(x, params):
    def conv(h, w, pad):
        return lax.conv_general_dilated(
            h, w, (1, 1), [(pad, pad), (pad, pad)],
            dimension_numbers=("NCHW", "OIHW", "NCHW"))

    h = jax.nn.relu(conv(x, params["conv1"], 1))
    for wa, wbk in params["blocks"]:
        t = jax.nn.relu(conv(h, wa, 1))
        t = jax.nn.relu(conv(t, wbk, 1))
        h = jax.nn.relu(t + h)
    return jnp.tanh(conv(h, params["conv2"], 0))


if __name__ == "__main__":
    key = jax.random.PRNGKey(0)
    k_x, k_p = jax.random.split(key)

    N, nc, H, W = 2, 4, 16, 16
    ngf = 8

    x = jax.random.normal(k_x, (N, nc, H, W), dtype=jnp.float32)
    params = init_params(k_p, nc, ngf)
    pw = prepare_params(params)

    out = jax.block_until_ready(refiner_forward(x, pw))
    ref = jax.block_until_ready(refiner_reference(x, params))

    assert out.shape == (N, nc, H, W), out.shape
    max_err = float(jnp.max(jnp.abs(out - ref)))
    # bf16 MXU operands + bf16 activation storage vs f32 reference -> relaxed tol
    assert jnp.allclose(out, ref, rtol=5e-2, atol=5e-3), max_err

    print("KERNEL_OK")
</pallas_src>

<mosaic_0001>
module attributes {stable_mosaic.version = 11 : i64} {
  func.func @kernel(%arg0: i32, %arg1: memref<1x16x640xbf16, #tpu.memory_space<vmem>>, %arg2: memref<1x384xf32, #tpu.memory_space<vmem>>, %arg3: memref<16x144xbf16, #tpu.memory_space<vmem>>, %arg4: memref<8x16x144xbf16, #tpu.memory_space<vmem>>, %arg5: memref<4x16xbf16, #tpu.memory_space<vmem>>, %arg6: memref<1x4x384xf32, #tpu.memory_space<vmem>>, %arg7: memref<16x640xbf16, #tpu.memory_space<vmem>>, %arg8: memref<16x640xbf16, #tpu.memory_space<vmem>>, %arg9: memref<144x384xbf16, #tpu.memory_space<vmem>>) attributes {dimension_semantics = [#tpu.dimension_semantics<parallel>], iteration_bounds = array<i64: 2>, scalar_prefetch = 0 : i64, scratch_operands = 3 : i64, tpu.core_type = #tpu.core_type<tc>, window_params = [{transform_indices = @transform_0, window_bounds = array<i64: 1, 16, 640>}, {pipeline_mode = #tpu.pipeline_mode<synchronous>, transform_indices = @transform_1, window_bounds = array<i64: 1, 384>}, {pipeline_mode = #tpu.pipeline_mode<synchronous>, transform_indices = @transform_2, window_bounds = array<i64: 16, 144>}, {pipeline_mode = #tpu.pipeline_mode<synchronous>, transform_indices = @transform_3, window_bounds = array<i64: 8, 16, 144>}, {pipeline_mode = #tpu.pipeline_mode<synchronous>, transform_indices = @transform_4, window_bounds = array<i64: 4, 16>}, {transform_indices = @transform_5, window_bounds = array<i64: 1, 4, 384>}]} {
    %cst = arith.constant 0.000000e+00 : bf16
    %0 = vector.broadcast %cst : bf16 to vector<16x128xbf16>
    %c0 = arith.constant 0 : index
    %c0_0 = arith.constant 0 : index
    %1 = vector.load %arg7[%c0, %c0_0] : memref<16x640xbf16, #tpu.memory_space<vmem>>, vector<16x128xbf16>
    tpu.vector_store %arg7[%c0, %c0_0], %0 {strides = array<i32>} : memref<16x640xbf16, #tpu.memory_space<vmem>>, vector<16x128xbf16>,
    %c0_1 = arith.constant 0 : index
    %c512 = arith.constant 512 : index
    %2 = vector.load %arg7[%c0_1, %c512] : memref<16x640xbf16, #tpu.memory_space<vmem>>, vector<16x128xbf16>
    tpu.vector_store %arg7[%c0_1, %c512], %0 {strides = array<i32>} : memref<16x640xbf16, #tpu.memory_space<vmem>>, vector<16x128xbf16>,
    %c0_2 = arith.constant 0 : index
    %c0_3 = arith.constant 0 : index
    %3 = vector.load %arg8[%c0_2, %c0_3] : memref<16x640xbf16, #tpu.memory_space<vmem>>, vector<16x128xbf16>
    tpu.vector_store %arg8[%c0_2, %c0_3], %0 {strides = array<i32>} : memref<16x640xbf16, #tpu.memory_space<vmem>>, vector<16x128xbf16>,
    %c0_4 = arith.constant 0 : index
    %c512_5 = arith.constant 512 : index
    %4 = vector.load %arg8[%c0_4, %c512_5] : memref<16x640xbf16, #tpu.memory_space<vmem>>, vector<16x128xbf16>
    tpu.vector_store %arg8[%c0_4, %c512_5], %0 {strides = array<i32>} : memref<16x640xbf16, #tpu.memory_space<vmem>>, vector<16x128xbf16>,
    %c0_6 = arith.constant 0 : index
    %c0_7 = arith.constant 0 : index
    %5 = vector.load %arg3[%c0_6, %c0_7] : memref<16x144xbf16, #tpu.memory_space<vmem>>, vector<16x144xbf16>
    %c0_8 = arith.constant 0 : index
    %c0_9 = arith.constant 0 : index
    %c109 = arith.constant 109 : index
    %6 = vector.load %arg1[%c0_8, %c0_9, %c109] : memref<1x16x640xbf16, #tpu.memory_space<vmem>>, vector<1x16x384xbf16>
    %7 = vector.shape_cast %6 : vector<1x16x384xbf16> to vector<16x384xbf16>
    %c0_10 = arith.constant 0 : index
    %c0_11 = arith.constant 0 : index
    %8 = vector.load %arg9[%c0_10, %c0_11] : memref<144x384xbf16, #tpu.memory_space<vmem>>, vector<16x384xbf16>
    tpu.vector_store %arg9[%c0_10, %c0_11], %7 {strides = array<i32>} : memref<144x384xbf16, #tpu.memory_space<vmem>>, vector<16x384xbf16>,
    %c0_12 = arith.constant 0 : index
    %c0_13 = arith.constant 0 : index
    %c110 = arith.constant 110 : index
    %9 = vector.load %arg1[%c0_12, %c0_13, %c110] : memref<1x16x640xbf16, #tpu.memory_space<vmem>>, vector<1x16x384xbf16>
    %10 = vector.shape_cast %9 : vector<1x16x384xbf16> to vector<16x384xbf16>
    %c16 = arith.constant 16 : index
    %c0_14 = arith.constant 0 : index
    %11 = vector.load %arg9[%c16, %c0_14] : memref<144x384xbf16, #tpu.memory_space<vmem>>, vector<16x384xbf16>
    tpu.vector_store %arg9[%c16, %c0_14], %10 {strides = array<i32>} : memref<144x384xbf16, #tpu.memory_space<vmem>>, vector<16x384xbf16>,
    %c0_15 = arith.constant 0 : index
    %c0_16 = arith.constant 0 : index
    %c111 = arith.constant 111 : index
    %12 = vector.load %arg1[%c0_15, %c0_16, %c111] : memref<1x16x640xbf16, #tpu.memory_space<vmem>>, vector<1x16x384xbf16>
    %13 = vector.shape_cast %12 : vector<1x16x384xbf16> to vector<16x384xbf16>
    %c32 = arith.constant 32 : index
    %c0_17 = arith.constant 0 : index
    %14 = vector.load %arg9[%c32, %c0_17] : memref<144x384xbf16, #tpu.memory_space<vmem>>, vector<16x384xbf16>
    tpu.vector_store %arg9[%c32, %c0_17], %13 {strides = array<i32>} : memref<144x384xbf16, #tpu.memory_space<vmem>>, vector<16x384xbf16>,
    %c0_18 = arith.constant 0 : index
    %c0_19 = arith.constant 0 : index
    %c127 = arith.constant 127 : index
    %15 = vector.load %arg1[%c0_18, %c0_19, %c127] : memref<1x16x640xbf16, #tpu.memory_space<vmem>>, vector<1x16x384xbf16>
    %16 = vector.shape_cast %15 : vector<1x16x384xbf16> to vector<16x384xbf16>
    %c48 = arith.constant 48 : index
    %c0_20 = arith.constant 0 : index
    %17 = vector.load %arg9[%c48, %c0_20] : memref<144x384xbf16, #tpu.memory_space<vmem>>, vector<16x384xbf16>
    tpu.vector_store %arg9[%c48, %c0_20], %16 {strides = array<i32>} : memref<144x384xbf16, #tpu.memory_space<vmem>>, vector<16x384xbf16>,
    %c0_21 = arith.constant 0 : index
    %c0_22 = arith.constant 0 : index
    %c128 = arith.constant 128 : index
    %18 = vector.load %arg1[%c0_21, %c0_22, %c128] : memref<1x16x640xbf16, #tpu.memory_space<vmem>>, vector<1x16x384xbf16>
    %19 = vector.shape_cast %18 : vector<1x16x384xbf16> to vector<16x384xbf16>
    %c64 = arith.constant 64 : index
    %c0_23 = arith.constant 0 : index
    %20 = vector.load %arg9[%c64, %c0_23] : memref<144x384xbf16, #tpu.memory_space<vmem>>, vector<16x384xbf16>
    tpu.vector_store %arg9[%c64, %c0_23], %19 {strides = array<i32>} : memref<144x384xbf16, #tpu.memory_space<vmem>>, vector<16x384xbf16>,
    %c0_24 = arith.constant 0 : index
    %c0_25 = arith.constant 0 : index
    %c129 = arith.constant 129 : index
    %21 = vector.load %arg1[%c0_24, %c0_25, %c129] : memref<1x16x640xbf16, #tpu.memory_space<vmem>>, vector<1x16x384xbf16>
    %22 = vector.shape_cast %21 : vector<1x16x384xbf16> to vector<16x384xbf16>
    %c80 = arith.constant 80 : index
    %c0_26 = arith.constant 0 : index
    %23 = vector.load %arg9[%c80, %c0_26] : memref<144x384xbf16, #tpu.memory_space<vmem>>, vector<16x384xbf16>
    tpu.vector_store %arg9[%c80, %c0_26], %22 {strides = array<i32>} : memref<144x384xbf16, #tpu.memory_space<vmem>>, vector<16x384xbf16>,
    %c0_27 = arith.constant 0 : index
    %c0_28 = arith.constant 0 : index
    %c145 = arith.constant 145 : index
    %24 = vector.load %arg1[%c0_27, %c0_28, %c145] : memref<1x16x640xbf16, #tpu.memory_space<vmem>>, vector<1x16x384xbf16>
    %25 = vector.shape_cast %24 : vector<1x16x384xbf16> to vector<16x384xbf16>
    %c96 = arith.constant 96 : index
    %c0_29 = arith.constant 0 : index
    %26 = vector.load %arg9[%c96, %c0_29] : memref<144x384xbf16, #tpu.memory_space<vmem>>, vector<16x384xbf16>
    tpu.vector_store %arg9[%c96, %c0_29], %25 {strides = array<i32>} : memref<144x384xbf16, #tpu.memory_space<vmem>>, vector<16x384xbf16>,
    %c0_30 = arith.constant 0 : index
    %c0_31 = arith.constant 0 : index
    %c146 = arith.constant 146 : index
    %27 = vector.load %arg1[%c0_30, %c0_31, %c146] : memref<1x16x640xbf16, #tpu.memory_space<vmem>>, vector<1x16x384xbf16>
    %28 = vector.shape_cast %27 : vector<1x16x384xbf16> to vector<16x384xbf16>
    %c112 = arith.constant 112 : index
    %c0_32 = arith.constant 0 : index
    %29 = vector.load %arg9[%c112, %c0_32] : memref<144x384xbf16, #tpu.memory_space<vmem>>, vector<16x384xbf16>
    tpu.vector_store %arg9[%c112, %c0_32], %28 {strides = array<i32>} : memref<144x384xbf16, #tpu.memory_space<vmem>>, vector<16x384xbf16>,
    %c0_33 = arith.constant 0 : index
    %c0_34 = arith.constant 0 : index
    %c147 = arith.constant 147 : index
    %30 = vector.load %arg1[%c0_33, %c0_34, %c147] : memref<1x16x640xbf16, #tpu.memory_space<vmem>>, vector<1x16x384xbf16>
    %31 = vector.shape_cast %30 : vector<1x16x384xbf16> to vector<16x384xbf16>
    %c128_35 = arith.constant 128 : index
    %c0_36 = arith.constant 0 : index
    %32 = vector.load %arg9[%c128_35, %c0_36] : memref<144x384xbf16, #tpu.memory_space<vmem>>, vector<16x384xbf16>
    tpu.vector_store %arg9[%c128_35, %c0_36], %31 {strides = array<i32>} : memref<144x384xbf16, #tpu.memory_space<vmem>>, vector<16x384xbf16>,
    %c0_37 = arith.constant 0 : index
    %c0_38 = arith.constant 0 : index
    %33 = vector.load %arg9[%c0_37, %c0_38] : memref<144x384xbf16, #tpu.memory_space<vmem>>, vector<144x384xbf16>
    %cst_39 = arith.constant dense<0.000000e+00> : vector<16x384xf32>
    %34 = tpu.matmul %5, %33, %cst_39 {dimension_numbers = #tpu.dot_dimension_numbers<[1], [0], [0], [1], [0, 0, 1, 1], [], []>} : vector<16x144xbf16>, vector<144x384xbf16>, vector<16x384xf32> -> vector<16x384xf32>
    %cst_40 = arith.constant 0.000000e+00 : f32
    %35 = vector.broadcast %cst_40 : f32 to vector<16x384xf32>
    %36 = arith.maximumf %34, %35 : vector<16x384xf32>
    %c0_41 = arith.constant 0 : index
    %c0_42 = arith.constant 0 : index
    %37 = vector.load %arg2[%c0_41, %c0_42] : memref<1x384xf32, #tpu.memory_space<vmem>>, vector<1x384xf32>
    %38 = vector.broadcast %37 : vector<1x384xf32> to vector<16x384xf32>
    %39 = arith.mulf %36, %38 : vector<16x384xf32>
    %40 = arith.truncf %39 : vector<16x384xf32> to vector<16x384xbf16>
    %c0_43 = arith.constant 0 : index
    %c128_44 = arith.constant 128 : index
    %41 = vector.load %arg7[%c0_43, %c128_44] : memref<16x640xbf16, #tpu.memory_space<vmem>>, vector<16x384xbf16>
    tpu.vector_store %arg7[%c0_43, %c128_44], %40 {strides = array<i32>} : memref<16x640xbf16, #tpu.memory_space<vmem>>, vector<16x384xbf16>,
    %c0_i32 = arith.constant 0 : i32
    %c4_i32 = arith.constant 4 : i32
    %42 = arith.addi %c0_i32, %c4_i32 : i32
    %c1_i32 = arith.constant 1 : i32
    scf.for %arg10 = %c0_i32 to %42 step %c1_i32  : i32 {
      %c2_i32 = arith.constant 2 : i32
      %50 = arith.muli %c2_i32, %arg10 : i32
      %51 = arith.index_cast %50 : i32 to index
      %c0_54 = arith.constant 0 : index
      %c0_55 = arith.constant 0 : index
      %52 = vector.load %arg4[%51, %c0_54, %c0_55] : memref<8x16x144xbf16, #tpu.memory_space<vmem>>, vector<1x16x144xbf16>
      %53 = vector.shape_cast %52 : vector<1x16x144xbf16> to vector<16x144xbf16>
      %c0_56 = arith.constant 0 : index
      %c109_57 = arith.constant 109 : index
      %54 = vector.load %arg7[%c0_56, %c109_57] : memref<16x640xbf16, #tpu.memory_space<vmem>>, vector<16x384xbf16>
      %c0_58 = arith.constant 0 : index
      %c0_59 = arith.constant 0 : index
      %55 = vector.load %arg9[%c0_58, %c0_59] : memref<144x384xbf16, #tpu.memory_space<vmem>>, vector<16x384xbf16>
      tpu.vector_store %arg9[%c0_58, %c0_59], %54 {strides = array<i32>} : memref<144x384xbf16, #tpu.memory_space<vmem>>, vector<16x384xbf16>,
      %c0_60 = arith.constant 0 : index
      %c110_61 = arith.constant 110 : index
      %56 = vector.load %arg7[%c0_60, %c110_61] : memref<16x640xbf16, #tpu.memory_space<vmem>>, vector<16x384xbf16>
      %c16_62 = arith.constant 16 : index
      %c0_63 = arith.constant 0 : index
      %57 = vector.load %arg9[%c16_62, %c0_63] : memref<144x384xbf16, #tpu.memory_space<vmem>>, vector<16x384xbf16>
      tpu.vector_store %arg9[%c16_62, %c0_63], %56 {strides = array<i32>} : memref<144x384xbf16, #tpu.memory_space<vmem>>, vector<16x384xbf16>,
      %c0_64 = arith.constant 0 : index
      %c111_65 = arith.constant 111 : index
      %58 = vector.load %arg7[%c0_64, %c111_65] : memref<16x640xbf16, #tpu.memory_space<vmem>>, vector<16x384xbf16>
      %c32_66 = arith.constant 32 : index
      %c0_67 = arith.constant 0 : index
      %59 = vector.load %arg9[%c32_66, %c0_67] : memref<144x384xbf16, #tpu.memory_space<vmem>>, vector<16x384xbf16>
      tpu.vector_store %arg9[%c32_66, %c0_67], %58 {strides = array<i32>} : memref<144x384xbf16, #tpu.memory_space<vmem>>, vector<16x384xbf16>,
      %c0_68 = arith.constant 0 : index
      %c127_69 = arith.constant 127 : index
      %60 = vector.load %arg7[%c0_68, %c127_69] : memref<16x640xbf16, #tpu.memory_space<vmem>>, vector<16x384xbf16>
      %c48_70 = arith.constant 48 : index
      %c0_71 = arith.constant 0 : index
      %61 = vector.load %arg9[%c48_70, %c0_71] : memref<144x384xbf16, #tpu.memory_space<vmem>>, vector<16x384xbf16>
      tpu.vector_store %arg9[%c48_70, %c0_71], %60 {strides = array<i32>} : memref<144x384xbf16, #tpu.memory_space<vmem>>, vector<16x384xbf16>,
      %c0_72 = arith.constant 0 : index
      %c128_73 = arith.constant 128 : index
      %62 = vector.load %arg7[%c0_72, %c128_73] : memref<16x640xbf16, #tpu.memory_space<vmem>>, vector<16x384xbf16>
      %c64_74 = arith.constant 64 : index
      %c0_75 = arith.constant 0 : index
      %63 = vector.load %arg9[%c64_74, %c0_75] : memref<144x384xbf16, #tpu.memory_space<vmem>>, vector<16x384xbf16>
      tpu.vector_store %arg9[%c64_74, %c0_75], %62 {strides = array<i32>} : memref<144x384xbf16, #tpu.memory_space<vmem>>, vector<16x384xbf16>,
      %c0_76 = arith.constant 0 : index
      %c129_77 = arith.constant 129 : index
      %64 = vector.load %arg7[%c0_76, %c129_77] : memref<16x640xbf16, #tpu.memory_space<vmem>>, vector<16x384xbf16>
      %c80_78 = arith.constant 80 : index
      %c0_79 = arith.constant 0 : index
      %65 = vector.load %arg9[%c80_78, %c0_79] : memref<144x384xbf16, #tpu.memory_space<vmem>>, vector<16x384xbf16>
      tpu.vector_store %arg9[%c80_78, %c0_79], %64 {strides = array<i32>} : memref<144x384xbf16, #tpu.memory_space<vmem>>, vector<16x384xbf16>,
      %c0_80 = arith.constant 0 : index
      %c145_81 = arith.constant 145 : index
      %66 = vector.load %arg7[%c0_80, %c145_81] : memref<16x640xbf16, #tpu.memory_space<vmem>>, vector<16x384xbf16>
      %c96_82 = arith.constant 96 : index
      %c0_83 = arith.constant 0 : index
      %67 = vector.load %arg9[%c96_82, %c0_83] : memref<144x384xbf16, #tpu.memory_space<vmem>>, vector<16x384xbf16>
      tpu.vector_store %arg9[%c96_82, %c0_83], %66 {strides = array<i32>} : memref<144x384xbf16, #tpu.memory_space<vmem>>, vector<16x384xbf16>,
      %c0_84 = arith.constant 0 : index
      %c146_85 = arith.constant 146 : index
      %68 = vector.load %arg7[%c0_84, %c146_85] : memref<16x640xbf16, #tpu.memory_space<vmem>>, vector<16x384xbf16>
      %c112_86 = arith.constant 112 : index
      %c0_87 = arith.constant 0 : index
      %69 = vector.load %arg9[%c112_86, %c0_87] : memref<144x384xbf16, #tpu.memory_space<vmem>>, vector<16x384xbf16>
      tpu.vector_store %arg9[%c112_86, %c0_87], %68 {strides = array<i32>} : memref<144x384xbf16, #tpu.memory_space<vmem>>, vector<16x384xbf16>,
      %c0_88 = arith.constant 0 : index
      %c147_89 = arith.constant 147 : index
      %70 = vector.load %arg7[%c0_88, %c147_89] : memref<16x640xbf16, #tpu.memory_space<vmem>>, vector<16x384xbf16>
      %c128_90 = arith.constant 128 : index
      %c0_91 = arith.constant 0 : index
      %71 = vector.load %arg9[%c128_90, %c0_91] : memref<144x384xbf16, #tpu.memory_space<vmem>>, vector<16x384xbf16>
      tpu.vector_store %arg9[%c128_90, %c0_91], %70 {strides = array<i32>} : memref<144x384xbf16, #tpu.memory_space<vmem>>, vector<16x384xbf16>,
      %c0_92 = arith.constant 0 : index
      %c0_93 = arith.constant 0 : index
      %72 = vector.load %arg9[%c0_92, %c0_93] : memref<144x384xbf16, #tpu.memory_space<vmem>>, vector<144x384xbf16>
      %cst_94 = arith.constant dense<0.000000e+00> : vector<16x384xf32>
      %73 = tpu.matmul %53, %72, %cst_94 {dimension_numbers = #tpu.dot_dimension_numbers<[1], [0], [0], [1], [0, 0, 1, 1], [], []>} : vector<16x144xbf16>, vector<144x384xbf16>, vector<16x384xf32> -> vector<16x384xf32>
      %cst_95 = arith.constant 0.000000e+00 : f32
      %74 = vector.broadcast %cst_95 : f32 to vector<16x384xf32>
      %75 = arith.maximumf %73, %74 : vector<16x384xf32>
      %c0_96 = arith.constant 0 : index
      %c0_97 = arith.constant 0 : index
      %76 = vector.load %arg2[%c0_96, %c0_97] : memref<1x384xf32, #tpu.memory_space<vmem>>, vector<1x384xf32>
      %77 = vector.broadcast %76 : vector<1x384xf32> to vector<16x384xf32>
      %78 = arith.mulf %75, %77 : vector<16x384xf32>
      %79 = arith.truncf %78 : vector<16x384xf32> to vector<16x384xbf16>
      %c0_98 = arith.constant 0 : index
      %c128_99 = arith.constant 128 : index
      %80 = vector.load %arg8[%c0_98, %c128_99] : memref<16x640xbf16, #tpu.memory_space<vmem>>, vector<16x384xbf16>
      tpu.vector_store %arg8[%c0_98, %c128_99], %79 {strides = array<i32>} : memref<16x640xbf16, #tpu.memory_space<vmem>>, vector<16x384xbf16>,
      %c2_i32_100 = arith.constant 2 : i32
      %81 = arith.muli %c2_i32_100, %arg10 : i32
      %c1_i32_101 = arith.constant 1 : i32
      %82 = arith.addi %81, %c1_i32_101 : i32
      %83 = arith.index_cast %82 : i32 to index
      %c0_102 = arith.constant 0 : index
      %c0_103 = arith.constant 0 : index
      %84 = vector.load %arg4[%83, %c0_102, %c0_103] : memref<8x16x144xbf16, #tpu.memory_space<vmem>>, vector<1x16x144xbf16>
      %85 = vector.shape_cast %84 : vector<1x16x144xbf16> to vector<16x144xbf16>
      %c0_104 = arith.constant 0 : index
      %c109_105 = arith.constant 109 : index
      %86 = vector.load %arg8[%c0_104, %c109_105] : memref<16x640xbf16, #tpu.memory_space<vmem>>, vector<16x384xbf16>
      %c0_106 = arith.constant 0 : index
      %c0_107 = arith.constant 0 : index
      %87 = vector.load %arg9[%c0_106, %c0_107] : memref<144x384xbf16, #tpu.memory_space<vmem>>, vector<16x384xbf16>
      tpu.vector_store %arg9[%c0_106, %c0_107], %86 {strides = array<i32>} : memref<144x384xbf16, #tpu.memory_space<vmem>>, vector<16x384xbf16>,
      %c0_108 = arith.constant 0 : index
      %c110_109 = arith.constant 110 : index
      %88 = vector.load %arg8[%c0_108, %c110_109] : memref<16x640xbf16, #tpu.memory_space<vmem>>, vector<16x384xbf16>
      %c16_110 = arith.constant 16 : index
      %c0_111 = arith.constant 0 : index
      %89 = vector.load %arg9[%c16_110, %c0_111] : memref<144x384xbf16, #tpu.memory_space<vmem>>, vector<16x384xbf16>
      tpu.vector_store %arg9[%c16_110, %c0_111], %88 {strides = array<i32>} : memref<144x384xbf16, #tpu.memory_space<vmem>>, vector<16x384xbf16>,
      %c0_112 = arith.constant 0 : index
      %c111_113 = arith.constant 111 : index
      %90 = vector.load %arg8[%c0_112, %c111_113] : memref<16x640xbf16, #tpu.memory_space<vmem>>, vector<16x384xbf16>
      %c32_114 = arith.constant 32 : index
      %c0_115 = arith.constant 0 : index
      %91 = vector.load %arg9[%c32_114, %c0_115] : memref<144x384xbf16, #tpu.memory_space<vmem>>, vector<16x384xbf16>
      tpu.vector_store %arg9[%c32_114, %c0_115], %90 {strides = array<i32>} : memref<144x384xbf16, #tpu.memory_space<vmem>>, vector<16x384xbf16>,
      %c0_116 = arith.constant 0 : index
      %c127_117 = arith.constant 127 : index
      %92 = vector.load %arg8[%c0_116, %c127_117] : memref<16x640xbf16, #tpu.memory_space<vmem>>, vector<16x384xbf16>
      %c48_118 = arith.constant 48 : index
      %c0_119 = arith.constant 0 : index
      %93 = vector.load %arg9[%c48_118, %c0_119] : memref<144x384xbf16, #tpu.memory_space<vmem>>, vector<16x384xbf16>
      tpu.vector_store %arg9[%c48_118, %c0_119], %92 {strides = array<i32>} : memref<144x384xbf16, #tpu.memory_space<vmem>>, vector<16x384xbf16>,
      %c0_120 = arith.constant 0 : index
      %c128_121 = arith.constant 128 : index
      %94 = vector.load %arg8[%c0_120, %c128_121] : memref<16x640xbf16, #tpu.memory_space<vmem>>, vector<16x384xbf16>
      %c64_122 = arith.constant 64 : index
      %c0_123 = arith.constant 0 : index
      %95 = vector.load %arg9[%c64_122, %c0_123] : memref<144x384xbf16, #tpu.memory_space<vmem>>, vector<16x384xbf16>
      tpu.vector_store %arg9[%c64_122, %c0_123], %94 {strides = array<i32>} : memref<144x384xbf16, #tpu.memory_space<vmem>>, vector<16x384xbf16>,
      %c0_124 = arith.constant 0 : index
      %c129_125 = arith.constant 129 : index
      %96 = vector.load %arg8[%c0_124, %c129_125] : memref<16x640xbf16, #tpu.memory_space<vmem>>, vector<16x384xbf16>
      %c80_126 = arith.constant 80 : index
      %c0_127 = arith.constant 0 : index
      %97 = vector.load %arg9[%c80_126, %c0_127] : memref<144x384xbf16, #tpu.memory_space<vmem>>, vector<16x384xbf16>
      tpu.vector_store %arg9[%c80_126, %c0_127], %96 {strides = array<i32>} : memref<144x384xbf16, #tpu.memory_space<vmem>>, vector<16x384xbf16>,
      %c0_128 = arith.constant 0 : index
      %c145_129 = arith.constant 145 : index
      %98 = vector.load %arg8[%c0_128, %c145_129] : memref<16x640xbf16, #tpu.memory_space<vmem>>, vector<16x384xbf16>
      %c96_130 = arith.constant 96 : index
      %c0_131 = arith.constant 0 : index
      %99 = vector.load %arg9[%c96_130, %c0_131] : memref<144x384xbf16, #tpu.memory_space<vmem>>, vector<16x384xbf16>
      tpu.vector_store %arg9[%c96_130, %c0_131], %98 {strides = array<i32>} : memref<144x384xbf16, #tpu.memory_space<vmem>>, vector<16x384xbf16>,
      %c0_132 = arith.constant 0 : index
      %c146_133 = arith.constant 146 : index
      %100 = vector.load %arg8[%c0_132, %c146_133] : memref<16x640xbf16, #tpu.memory_space<vmem>>, vector<16x384xbf16>
      %c112_134 = arith.constant 112 : index
      %c0_135 = arith.constant 0 : index
      %101 = vector.load %arg9[%c112_134, %c0_135] : memref<144x384xbf16, #tpu.memory_space<vmem>>, vector<16x384xbf16>
      tpu.vector_store %arg9[%c112_134, %c0_135], %100 {strides = array<i32>} : memref<144x384xbf16, #tpu.memory_space<vmem>>, vector<16x384xbf16>,
      %c0_136 = arith.constant 0 : index
      %c147_137 = arith.constant 147 : index
      %102 = vector.load %arg8[%c0_136, %c147_137] : memref<16x640xbf16, #tpu.memory_space<vmem>>, vector<16x384xbf16>
      %c128_138 = arith.constant 128 : index
      %c0_139 = arith.constant 0 : index
      %103 = vector.load %arg9[%c128_138, %c0_139] : memref<144x384xbf16, #tpu.memory_space<vmem>>, vector<16x384xbf16>
      tpu.vector_store %arg9[%c128_138, %c0_139], %102 {strides = array<i32>} : memref<144x384xbf16, #tpu.memory_space<vmem>>, vector<16x384xbf16>,
      %c0_140 = arith.constant 0 : index
      %c0_141 = arith.constant 0 : index
      %104 = vector.load %arg9[%c0_140, %c0_141] : memref<144x384xbf16, #tpu.memory_space<vmem>>, vector<144x384xbf16>
      %cst_142 = arith.constant dense<0.000000e+00> : vector<16x384xf32>
      %105 = tpu.matmul %85, %104, %cst_142 {dimension_numbers = #tpu.dot_dimension_numbers<[1], [0], [0], [1], [0, 0, 1, 1], [], []>} : vector<16x144xbf16>, vector<144x384xbf16>, vector<16x384xf32> -> vector<16x384xf32>
      %cst_143 = arith.constant 0.000000e+00 : f32
      %106 = vector.broadcast %cst_143 : f32 to vector<16x384xf32>
      %107 = arith.maximumf %105, %106 : vector<16x384xf32>
      %c0_144 = arith.constant 0 : index
      %c0_145 = arith.constant 0 : index
      %108 = vector.load %arg2[%c0_144, %c0_145] : memref<1x384xf32, #tpu.memory_space<vmem>>, vector<1x384xf32>
      %109 = vector.broadcast %108 : vector<1x384xf32> to vector<16x384xf32>
      %110 = arith.mulf %107, %109 : vector<16x384xf32>
      %c0_146 = arith.constant 0 : index
      %c128_147 = arith.constant 128 : index
      %111 = vector.load %arg7[%c0_146, %c128_147] : memref<16x640xbf16, #tpu.memory_space<vmem>>, vector<16x384xbf16>
      %112 = arith.extf %111 : vector<16x384xbf16> to vector<16x384xf32>
      %113 = arith.addf %110, %112 : vector<16x384xf32>
      %cst_148 = arith.constant 0.000000e+00 : f32
      %114 = vector.broadcast %cst_148 : f32 to vector<16x384xf32>
      %115 = arith.maximumf %113, %114 : vector<16x384xf32>
      %116 = arith.truncf %115 : vector<16x384xf32> to vector<16x384xbf16>
      %c0_149 = arith.constant 0 : index
      %c128_150 = arith.constant 128 : index
      %117 = vector.load %arg7[%c0_149, %c128_150] : memref<16x640xbf16, #tpu.memory_space<vmem>>, vector<16x384xbf16>
      tpu.vector_store %arg7[%c0_149, %c128_150], %116 {strides = array<i32>} : memref<16x640xbf16, #tpu.memory_space<vmem>>, vector<16x384xbf16>,
    }
    %c4_i32_45 = arith.constant 4 : i32
    %c0_46 = arith.constant 0 : index
    %c0_47 = arith.constant 0 : index
    %43 = vector.load %arg5[%c0_46, %c0_47] : memref<4x16xbf16, #tpu.memory_space<vmem>>, vector<4x16xbf16>
    %c0_48 = arith.constant 0 : index
    %c128_49 = arith.constant 128 : index
    %44 = vector.load %arg7[%c0_48, %c128_49] : memref<16x640xbf16, #tpu.memory_space<vmem>>, vector<16x384xbf16>
    %cst_50 = arith.constant dense<0.000000e+00> : vector<4x384xf32>
    %45 = tpu.matmul %43, %44, %cst_50 {dimension_numbers = #tpu.dot_dimension_numbers<[1], [0], [0], [1], [0, 0, 1, 1], [], []>} : vector<4x16xbf16>, vector<16x384xbf16>, vector<4x384xf32> -> vector<4x384xf32>
    %46 = math.tanh %45 : vector<4x384xf32>
    %c0_51 = arith.constant 0 : index
    %c0_52 = arith.constant 0 : index
    %c0_53 = arith.constant 0 : index
    %47 = vector.load %arg6[%c0_51, %c0_52, %c0_53] : memref<1x4x384xf32, #tpu.memory_space<vmem>>, vector<1x4x384xf32>
    %48 = vector.shape_cast %47 : vector<1x4x384xf32> to vector<4x384xf32>
    %49 = vector.shape_cast %46 : vector<4x384xf32> to vector<1x4x384xf32>
    tpu.vector_store %arg6[%c0_51, %c0_52, %c0_53], %49 {strides = array<i32>} : memref<1x4x384xf32, #tpu.memory_space<vmem>>, vector<1x4x384xf32>,
    return
  }
  func.func @transform_0(%arg0: i32) -> (i32, i32, i32) {
    %c0_i32 = arith.constant 0 : i32
    %c0_i32_0 = arith.constant 0 : i32
    %c0_i32_1 = arith.constant 0 : i32
    return %arg0, %c0_i32, %c0_i32_0 : i32, i32, i32
  }
  func.func @transform_1(%arg0: i32) -> (i32, i32) {
    %c0_i32 = arith.constant 0 : i32
    %c0_i32_0 = arith.constant 0 : i32
    %c0_i32_1 = arith.constant 0 : i32
    return %c0_i32, %c0_i32_0 : i32, i32
  }
  func.func @transform_2(%arg0: i32) -> (i32, i32) {
    %c0_i32 = arith.constant 0 : i32
    %c0_i32_0 = arith.constant 0 : i32
    %c0_i32_1 = arith.constant 0 : i32
    return %c0_i32, %c0_i32_0 : i32, i32
  }
  func.func @transform_3(%arg0: i32) -> (i32, i32, i32) {
    %c0_i32 = arith.constant 0 : i32
    %c0_i32_0 = arith.constant 0 : i32
    %c0_i32_1 = arith.constant 0 : i32
    %c0_i32_2 = arith.constant 0 : i32
    return %c0_i32, %c0_i32_0, %c0_i32_1 : i32, i32, i32
  }
  func.func @transform_4(%arg0: i32) -> (i32, i32) {
    %c0_i32 = arith.constant 0 : i32
    %c0_i32_0 = arith.constant 0 : i32
    %c0_i32_1 = arith.constant 0 : i32
    return %c0_i32, %c0_i32_0 : i32, i32
  }
  func.func @transform_5(%arg0: i32) -> (i32, i32, i32) {
    %c0_i32 = arith.constant 0 : i32
    %c0_i32_0 = arith.constant 0 : i32
    %c0_i32_1 = arith.constant 0 : i32
    return %arg0, %c0_i32, %c0_i32_0 : i32, i32, i32
  }
}

</mosaic_0001>

<bundles_post_ra>
// kernel: refiner_forward.1
= control target key start
LH: loop header
LB: loop body
LE: loop exit
PB: predicated region body
PF: predicated region fallthrough
CT: control target
= control target key end

     0   :  { %s1856_s18 = smov 0   ;;  %s2202_s0 = inlined_call_operand.vmem [shape: bf16[2,16,640], index: 0, kind: input, shape index: {}]   ;;  %s2203_s1 = inlined_call_operand.vmem [shape: f32[1,384], index: 1, kind: input, shape index: {}]   ;;  %s2204_s2 = inlined_call_operand.vmem [shape: bf16[16,144], index: 2, kind: input, shape index: {}]   ;;  %s2205_s3 = inlined_call_operand.vmem [shape: bf16[8,16,144], index: 3, kind: input, shape index: {}]   ;;  %s2206_s4 = inlined_call_operand.vmem [shape: bf16[4,16], index: 4, kind: input, shape index: {}]   ;;  %s2207_s5 = inlined_call_operand.vmem [shape: f32[2,4,384], index: 5, kind: output, shape index: {}]  }
   0x1 LB: > { %s1648_s19 = sadd.s32 4294967295, %s1800_s18   ;;  %p1652_p0 = scmp.ge.s32.totalorder %s1800_s18, 1  ;;  %s1800_s18 = sphi %s1856_s18, %s15_s18  }
   0x2   : > { %p187_p1 = scmp.lt.s32.totalorder %s1800_s18, 3 }
   0x4   : > { %p188_p2 = pnand %p1652_p0, %p187_p1 }
   0x5   : > { %p215_p3 = scmp.lt.s32.totalorder (!%p188_p2), %s1648_s19, 1  ;;  %v1806_v0 = vmov (!%p188_p2), 0   ;;  %s1807_s28 = smov (!%p188_p2), 19   ;;  %v1777_v10 = vld [vmem:[%s2204_s2 + $0x4] ss:$8 sps:$4 sm:$0xff] (!%p188_p2)   ;;  %vm595_vm0 = vcmask (!%p188_p2), 130048  }
   0x6   : > { %191 = sbr.rel (%p188_p2) target bundleno = 1457 (0x5b1), region = 40  ;;  %226 = vst [vmem:[#allocation2] sm:$0xff] (!%p188_p2), %v1806_v0  ;;  %227 = vst [vmem:[#allocation2 + $0x20] sm:$0xff] (!%p188_p2), %v1806_v0  ;;  %642 = vmatprep.subr.bf16.mxu1 (!%p188_p2), %v1806_v0  ;;  %s1808_s29 = smov (!%p188_p2), 18   ;;  %1692 = vmatprep.mubr.msk.bf16.mxu0 (!%p188_p2), %vm595_vm0, %v1777_v10  ;;  %vm260_vm1 = vcmask (!%p188_p2), 154624   ;;  %vm298_vm2 = vcmask (!%p188_p2), 146432  }
   0x7   : > { %228 = vst [vmem:[#allocation3] sm:$0xff] (!%p188_p2), %v1806_v0  ;;  %229 = vst [vmem:[#allocation3 + $0x20] sm:$0xff] (!%p188_p2), %v1806_v0  ;;  %s1809_s30 = smov (!%p188_p2), 17   ;;  %s1810_s6 = smov (!%p188_p2), 1   ;;  %1693 = vmatprep.mubr.msk.bf16.mxu1 (!%p188_p2), %vm595_vm0, %v1777_v10  ;;  %vm336_vm3 = vcmask (!%p188_p2), 138240   ;;  %vm374_vm4 = vcmask (!%p188_p2), 7168  }
   0x8   : > { %s1811_s7 = smov (!%p188_p2), 127   ;;  %s1812_s8 = smov (!%p188_p2), 111   ;;  %vm435_vm5 = vcmask (!%p188_p2), 1039360   ;;  %vm473_vm6 = vcmask (!%p188_p2), 908288   ;;  %vm511_vm7 = vcmask (!%p188_p2), 900096   ;;  %vm549_vm8 = vcmask (!%p188_p2), 891904  }
   0x9   : > { %s1813_s9 = smov (!%p188_p2), 110   ;;  %s1814_s12 = smov (!%p188_p2), 109  }
   0xa   : > { %s1957_s17 = smov (!%p188_p2), 0  }
   0xd   : > { %s2209_s19 = smov (!%p215_p3, %s1648_s19), 1 }
   0xe   : > { %s1724_s20 = smul.u32 40, %s2209_s19 }
   0xf   : > { %s1725_s21 = smul.u32 12, %s2209_s19 }
  0x10   : > { %s1872_s24 = scalar_lea.vmem %s2202_s0, %s1724_s20 }
  0x11   : > { %s1877_s27 = scalar_lea.vmem %s2207_s5, %s1725_s21  ;;  %v1762_v1 = vld [vmem:[%s1872_s24 + $0x4] ss:$20 sps:$4 sm:$0xff]   ;;  %v1764_v2 = vld [vmem:[%s1872_s24] ss:$20 sps:$4 sm:$0xff]   ;;  %v1765_v3 = vld [vmem:[%s1872_s24 + $0x8] ss:$20 sps:$4 sm:$0xff]  }
  0x12   : > { %254 = vrot.lane.b32.xlu0 %v1762_v1, %s1807_s28  ;;  %v1767_v4 = vld [vmem:[%s1872_s24 + $0xc] ss:$20 sps:$4 sm:$0xff]   ;;  %252 = vrot.lane.b32.xlu1 %v1764_v2, %s1807_s28  ;;  %v1884_v5 = vld [vmem:[%s1872_s24 + $0x8] ss:$20 sps:$4 sm:$0xff]  }
  0x13   : > { %v1887_v6 = vld [vmem:[%s1872_s24 + $0x4] ss:$20 sps:$4 sm:$0xff]   ;;  %v1890_v7 = vld [vmem:[%s1872_s24 + $0xc] ss:$20 sps:$4 sm:$0xff]  }
  0x14   : > { %v1770_v8 = vld [vmem:[%s1872_s24 + $0xc] ss:$20 sps:$4 sm:$0xff]   ;;  %v1773_v9 = vld [vmem:[%s1872_s24 + $0x10] ss:$20 sps:$4 sm:$0xff]  }
  0x16   : > { %256 = vrot.lane.b32.xlu0 %v1765_v3, %s1807_s28  ;;  %258 = vrot.lane.b32.xlu1 %v1767_v4, %s1807_s28 }
  0x1a   : > { %292 = vrot.lane.b32.xlu0 %v1762_v1, %s1808_s29  ;;  %294 = vrot.lane.b32.xlu1 %v1765_v3, %s1808_s29 }
  0x1e   : > { %290 = vrot.lane.b32.xlu0 %v1764_v2, %s1808_s29  ;;  %296 = vrot.lane.b32.xlu1 %v1767_v4, %s1808_s29 }
  0x22   : > { %330 = vrot.lane.b32.xlu0 %v1762_v1, %s1809_s30  ;;  %332 = vrot.lane.b32.xlu1 %v1765_v3, %s1809_s30 }
  0x26   : > { %328 = vrot.lane.b32.xlu0 %v1764_v2, %s1809_s30  ;;  %334 = vrot.lane.b32.xlu1 %v1767_v4, %s1809_s30 }
  0x2a   : > { %368 = vrot.lane.b32.xlu0 %v1762_v1, %s1810_s6  ;;  %370 = vrot.lane.b32.xlu1 %v1765_v3, %s1810_s6  ;;  %v1775_v3 = vld [vmem:[%s2204_s2] ss:$8 sps:$4 sm:$0xff]  }
  0x2e   : > { %366 = vrot.lane.b32.xlu0 %v1764_v2, %s1810_s6  ;;  %372 = vrot.lane.b32.xlu1 %v1767_v4, %s1810_s6 }
  0x32   : > { %429 = vrot.lane.b32.xlu0 %v1884_v5, %s1811_s7  ;;  %431 = vrot.lane.b32.xlu1 %v1770_v8, %s1811_s7 }
  0x36   : > { %427 = vrot.lane.b32.xlu0 %v1887_v6, %s1811_s7  ;;  %433 = vrot.lane.b32.xlu1 %v1773_v9, %s1811_s7 }
  0x3a   : > { %467 = vrot.lane.b32.xlu0 %v1884_v5, %s1812_s8  ;;  %469 = vrot.lane.b32.xlu1 %v1770_v8, %s1812_s8 }
  0x3e   : > { %465 = vrot.lane.b32.xlu0 %v1887_v6, %s1812_s8  ;;  %471 = vrot.lane.b32.xlu1 %v1773_v9, %s1812_s8 }
  0x42   : > { %505 = vrot.lane.b32.xlu0 %v1884_v5, %s1813_s9  ;;  %507 = vrot.lane.b32.xlu1 %v1770_v8, %s1813_s9 }
  0x46   : > { %503 = vrot.lane.b32.xlu0 %v1887_v6, %s1813_s9  ;;  %509 = vrot.lane.b32.xlu1 %v1773_v9, %s1813_s9 }
  0x4a   : > { %543 = vrot.lane.b32.xlu0 %v1884_v5, %s1814_s12  ;;  %545 = vrot.lane.b32.xlu1 %v1770_v8, %s1814_s12  ;;  %v689_v8 = vld [vmem:[%s2203_s1] sm:$0x7] }
  0x4e   : > { %541 = vrot.lane.b32.xlu0 %v1887_v6, %s1814_s12  ;;  %547 = vrot.lane.b32.xlu1 %v1773_v9, %s1814_s12 }
  0x84   : > { %v255_v11 = vpop.permute.xlu0 %254  ;;  %v253_v12 = vpop.permute.xlu1 %252 }
  0x85   : > { %v261_v13 = vsel %vm260_vm1, %v253_v12, %v255_v11 }
  0x88   : > { %v257_v14 = vpop.permute.xlu0 %256  ;;  %v259_v16 = vpop.permute.xlu1 %258 }
  0x89   : > { %v262_v15 = vsel %vm260_vm1, %v255_v11, %v257_v14  ;;  %v263_v17 = vsel %vm260_vm1, %v257_v14, %v259_v16 }
  0x8a   : > { %599 = vmatprep.subr.bf16.mxu0 %v262_v15  ;;  %643 = vmatpush1.bf16.msra.mxu1 %v263_v17 }
  0x8b   : > { %600 = vmatpush1.bf16.msra.mxu0 %v261_v13  ;;  %644 = vmatprep.subr.bf16.mxu1 %v1806_v0 }
  0x8c   : > { %v293_v18 = vpop.permute.xlu0 %292  ;;  %v295_v19 = vpop.permute.xlu1 %294 }
  0x8d   : > { %v300_v20 = vsel %vm298_vm2, %v293_v18, %v295_v19 }
  0x8e   : > { %601 = vmatprep.subr.bf16.mxu0 %v300_v20 }
  0x90   : > { %v291_v21 = vpop.permute.xlu0 %290  ;;  %v297_v23 = vpop.permute.xlu1 %296 }
  0x91   : > { %v299_v22 = vsel %vm298_vm2, %v291_v21, %v293_v18  ;;  %v301_v24 = vsel %vm298_vm2, %v295_v19, %v297_v23 }
  0x92   : > { %602 = vmatpush1.bf16.msra.mxu0 %v299_v22  ;;  %645 = vmatpush1.bf16.msra.mxu1 %v301_v24 }
  0x93   : > { %646 = vmatprep.subr.bf16.mxu1 %v1806_v0 }
  0x94   : > { %v331_v25 = vpop.permute.xlu0 %330  ;;  %v333_v26 = vpop.permute.xlu1 %332 }
  0x95   : > { %v338_v27 = vsel %vm336_vm3, %v331_v25, %v333_v26 }
  0x96   : > { %603 = vmatprep.subr.bf16.mxu0 %v338_v27 }
  0x98   : > { %v329_v28 = vpop.permute.xlu0 %328  ;;  %v335_v30 = vpop.permute.xlu1 %334 }
  0x99   : > { %v337_v29 = vsel %vm336_vm3, %v329_v28, %v331_v25  ;;  %v339_v31 = vsel %vm336_vm3, %v333_v26, %v335_v30 }
  0x9a   : > { %604 = vmatpush1.bf16.msra.mxu0 %v337_v29  ;;  %647 = vmatpush1.bf16.msra.mxu1 %v339_v31 }
  0x9b   : > { %648 = vmatprep.subr.bf16.mxu1 %v1806_v0 }
  0x9c   : > { %v369_v32 = vpop.permute.xlu0 %368  ;;  %v371_v33 = vpop.permute.xlu1 %370 }
  0x9d   : > { %v376_v34 = vsel %vm374_vm4, %v369_v32, %v371_v33 }
  0x9e   : > { %605 = vmatprep.subr.bf16.mxu0 %v376_v34 }
  0xa0   : > { %v367_v35 = vpop.permute.xlu0 %366  ;;  %v373_v37 = vpop.permute.xlu1 %372 }
  0xa1   : > { %v375_v36 = vsel %vm374_vm4, %v367_v35, %v369_v32  ;;  %v377_v38 = vsel %vm374_vm4, %v371_v33, %v373_v37 }
  0xa2   : > { %606 = vmatpush1.bf16.msra.mxu0 %v375_v36  ;;  %649 = vmatpush1.bf16.msra.mxu1 %v377_v38 }
  0xa3   : > { %607 = vmatprep.subr.bf16.mxu0 %v1884_v5  ;;  %650 = vmatprep.subr.bf16.mxu1 %v1806_v0  ;;  %v691_v5 = vlaneseq }
  0xa4   : > { %v430_v39 = vpop.permute.xlu0 %429  ;;  %v432_v40 = vpop.permute.xlu1 %431 }
  0xa5   : > { %v437_v41 = vsel %vm435_vm5, %v430_v39, %v432_v40 }
  0xa6   : > { %608 = vmatpush1.bf16.msra.mxu0 %v1887_v6  ;;  %651 = vmatpush1.bf16.msra.mxu1 %v1890_v7  ;;  %v692_v6 = vshrl.u32 %v691_v5, 7 }
  0xa7   : > { %609 = vmatprep.subr.bf16.mxu0 %v437_v41  ;;  %652 = vmatprep.subr.bf16.mxu1 %v1806_v0 }
  0xa8   : > { %v428_v42 = vpop.permute.xlu0 %427  ;;  %v434_v44 = vpop.permute.xlu1 %433  ;;  %v1945_v7 = vsub.s32 2, %v692_v6  ;;  %v1950_v9 = vsub.s32 0, %v692_v6  ;;  %v1952_v10 = vsub.s32 1, %v692_v6 }
  0xa9   : > { %v436_v43 = vsel %vm435_vm5, %v428_v42, %v430_v39  ;;  %v438_v45 = vsel %vm435_vm5, %v432_v40, %v434_v44 }
  0xaa   : > { %610 = vmatpush1.bf16.msra.mxu0 %v436_v43  ;;  %653 = vmatpush1.bf16.msra.mxu1 %v438_v45  ;;  %v702_v12 = vrot.slane %v689_v8, %v1945_v7  ;;  %v694_v14 = vrot.slane %v689_v8, %v1950_v9  ;;  %v698_v19 = vrot.slane %v689_v8, %v1952_v10 }
  0xab   : > { %654 = vmatprep.subr.bf16.mxu1 %v1806_v0 }
  0xac   : > { %v468_v46 = vpop.permute.xlu0 %467  ;;  %v470_v47 = vpop.permute.xlu1 %469 }
  0xad   : > { %v475_v48 = vsel %vm473_vm6, %v468_v46, %v470_v47 }
  0xae   : > { %611 = vmatprep.subr.bf16.mxu0 %v475_v48 }
  0xb0   : > { %v466_v49 = vpop.permute.xlu0 %465  ;;  %v472_v51 = vpop.permute.xlu1 %471 }
  0xb1   : > { %v474_v50 = vsel %vm473_vm6, %v466_v49, %v468_v46  ;;  %v476_v52 = vsel %vm473_vm6, %v470_v47, %v472_v51 }
  0xb2   : > { %612 = vmatpush1.bf16.msra.mxu0 %v474_v50  ;;  %655 = vmatpush1.bf16.msra.mxu1 %v476_v52 }
  0xb3   : > { %656 = vmatprep.subr.bf16.mxu1 %v1806_v0 }
  0xb4   : > { %v506_v53 = vpop.permute.xlu0 %505  ;;  %v508_v54 = vpop.permute.xlu1 %507 }
  0xb5   : > { %v513_v55 = vsel %vm511_vm7, %v506_v53, %v508_v54 }
  0xb6   : > { %613 = vmatprep.subr.bf16.mxu0 %v513_v55 }
  0xb8   : > { %v504_v56 = vpop.permute.xlu0 %503  ;;  %v510_v58 = vpop.permute.xlu1 %509 }
  0xb9   : > { %v512_v57 = vsel %vm511_vm7, %v504_v56, %v506_v53  ;;  %v514_v59 = vsel %vm511_vm7, %v508_v54, %v510_v58 }
  0xba   : > { %614 = vmatpush1.bf16.msra.mxu0 %v512_v57  ;;  %657 = vmatpush1.bf16.msra.mxu1 %v514_v59 }
  0xbb   : > { %658 = vmatprep.subr.bf16.mxu1 %v1806_v0 }
  0xbc   : > { %v544_v60 = vpop.permute.xlu0 %543  ;;  %v546_v61 = vpop.permute.xlu1 %545 }
  0xbd   : > { %v551_v62 = vsel %vm549_vm8, %v544_v60, %v546_v61 }
  0xbe   : > { %615 = vmatprep.subr.bf16.mxu0 %v551_v62 }
  0xc0   : > { %v542_v63 = vpop.permute.xlu0 %541  ;;  %v548_v2 = vpop.permute.xlu1 %547 }
  0xc1   : > { %v550_v1 = vsel %vm549_vm8, %v542_v63, %v544_v60  ;;  %v552_v4 = vsel %vm549_vm8, %v546_v61, %v548_v2 }
  0xc2   : > { %616 = vmatpush1.bf16.msra.mxu0 %v550_v1  ;;  %659 = vmatpush1.bf16.msra.mxu1 %v552_v4 }
  0xc5   : > { %632 = vmatmul.mubr.bf16.vlgmr.msra.gmra.mrb[0].mxu0 %v1775_v3  ;;  %675 = vmatmul.mubr.bf16.vlgmr.msra.gmra.mrb[0].mxu1 %v1775_v3 }
 0x198   : > { %v633_v11 = vpop.f32.mrb[0].mxu0  ;;  %v676_v15 = vpop.f32.mrb[0].mxu1 }
 0x199   : > { %v683_v13 = vmax.f32 %v633_v11, 0.0  ;;  %v635_v16 = vpop.f32.mrb[1].mxu0  ;;  %v685_v17 = vmax.f32 %v676_v15, 0.0  ;;  %v678_v20 = vpop.f32.mrb[1].mxu1 }
 0x19a   : > { %v684_v18 = vmax.f32 %v635_v16, 0.0  ;;  %v637_v21 = vpop.f32.mrb[2].mxu0  ;;  %v679_v23 = vpop.f32.mrb[2].mxu1 }
 0x19b   : > { %v686_v22 = vmax.f32 %v637_v21, 0.0  ;;  %v639_v24 = vpop.f32.mrb[3].mxu0  ;;  %v708_v25 = vmul.f32 %v702_v12, %v685_v17  ;;  %v688_v26 = vmax.f32 %v679_v23, 0.0  ;;  %v681_v28 = vpop.f32.mrb[3].mxu1  ;;  %v706_v29 = vmul.f32 %v694_v14, %v683_v13 }
 0x19c   : > { %v687_v27 = vmax.f32 %v639_v24, 0.0  ;;  %v707_v31 = vmul.f32 %v698_v19, %v684_v18 }
 0x19d   : > { %v709_v30 = vmul.f32 %v694_v14, %v686_v22  ;;  %v711_v32 = vmul.f32 %v702_v12, %v688_v26 }
 0x19e   : > { %v710_v33 = vmul.f32 %v698_v19, %v687_v27 }
 0x19f   : > { %v712_v34 = vpack.c.bf16 %v709_v30, %v706_v29  ;;  %v714_v35 = vpack.c.bf16 %v711_v32, %v708_v25 }
 0x1a0   : > { %v713_v36 = vpack.c.bf16 %v710_v33, %v707_v31 }
 0x1a1   : > { %715 = vst [vmem:[#allocation2 + $0x8] sm:$0xff] %v712_v34  ;;  %717 = vst [vmem:[#allocation2 + $0x18] sm:$0xff] %v714_v35 }
 0x1a2   : > { %716 = vst [vmem:[#allocation2 + $0x10] sm:$0xff] %v713_v36 }
 0x1a3 LB: >> { %v730_v38 = vld [vmem:[#allocation2] sm:$0xff]  ;;  %s1815_s19 = smov 19   ;;  %v1816_v41 = vmov 0   ;;  %s1817_s20 = smov 18   ;;  %s1804_s17 = sphi %s1957_s17, %s723_s17  }
 0x1a4   : >> { %738 = vrot.lane.b32.xlu1 %v730_v38, %s1815_s19  ;;  %1018 = vmatprep.subr.bf16.mxu1 %v1816_v41  ;;  %s1818_s21 = smov 17   ;;  %s1819_s22 = smov 1   ;;  %v839_v42 = vld [vmem:[#allocation2 + $0x20] sm:$0xff] }
 0x1a5   : >> { %s1820_s23 = smov 127   ;;  %s1821_s24 = smov 111  }
 0x1a6   : >> { %s1714_s25 = sshll.u32 %s1804_s17, 5  ;;  %s1822_s30 = smov 110  }
 0x1a7   : >> { %s2015_s29 = scalar_lea.vmem %s2205_s3, %s1714_s25  ;;  %s1823_s6 = smov 109  }
 0x1a8   : >> { %v1962_v37 = vld [vmem:[#allocation2 + $0x8] sm:$0xff]  ;;  %v1969_v40 = vld [vmem:[#allocation2 + $0x18] sm:$0xff]  ;;  %s723_s17 = sadd.s32 1, %s1804_s17  }
 0x1a9   : >> { %740 = vrot.lane.b32.xlu0 %v1962_v37, %s1815_s19  ;;  %v1967_v39 = vld [vmem:[#allocation2 + $0x10] sm:$0xff]  ;;  %744 = vrot.lane.b32.xlu1 %v1969_v40, %s1815_s19  ;;  %v1780_v43 = vld [vmem:[%s2015_s29 + $0x4] ss:$8 sps:$4 sm:$0xff]   ;;  %p720_p4 = scmp.ge.s32.totalorder %s723_s17, 4  }
 0x1aa   : >> { %1699 = vmatprep.mubr.msk.bf16.mxu0 %vm595_vm0, %v1780_v43  ;;  %1700 = vmatprep.mubr.msk.bf16.mxu1 %vm595_vm0, %v1780_v43  ;;  %v1778_v43 = vld [vmem:[%s2015_s29] ss:$8 sps:$4 sm:$0xff]   ;;  %vm1825_vm9 = vmmov (%p720_p4), 0  }
 0x1ad   : >> { %742 = vrot.lane.b32.xlu0 %v1967_v39, %s1815_s19  ;;  %767 = vrot.lane.b32.xlu1 %v1967_v39, %s1817_s20 }
 0x1b1   : >> { %765 = vrot.lane.b32.xlu0 %v1962_v37, %s1817_s20  ;;  %769 = vrot.lane.b32.xlu1 %v1969_v40, %s1817_s20 }
 0x1b5   : >> { %763 = vrot.lane.b32.xlu0 %v730_v38, %s1817_s20  ;;  %792 = vrot.lane.b32.xlu1 %v1967_v39, %s1818_s21 }
 0x1b9   : >> { %790 = vrot.lane.b32.xlu0 %v1962_v37, %s1818_s21  ;;  %794 = vrot.lane.b32.xlu1 %v1969_v40, %s1818_s21 }
 0x1bd   : >> { %788 = vrot.lane.b32.xlu0 %v730_v38, %s1818_s21  ;;  %817 = vrot.lane.b32.xlu1 %v1967_v39, %s1819_s22 }
 0x1c1   : >> { %815 = vrot.lane.b32.xlu0 %v1962_v37, %s1819_s22  ;;  %819 = vrot.lane.b32.xlu1 %v1969_v40, %s1819_s22 }
 0x1c5   : >> { %813 = vrot.lane.b32.xlu0 %v730_v38, %s1819_s22  ;;  %848 = vrot.lane.b32.xlu1 %v1969_v40, %s1820_s23 }
 0x1c9   : >> { %846 = vrot.lane.b32.xlu0 %v1967_v39, %s1820_s23  ;;  %850 = vrot.lane.b32.xlu1 %v839_v42, %s1820_s23 }
 0x1cd   : >> { %844 = vrot.lane.b32.xlu0 %v1962_v37, %s1820_s23  ;;  %873 = vrot.lane.b32.xlu1 %v1969_v40, %s1821_s24 }
 0x1d1   : >> { %871 = vrot.lane.b32.xlu0 %v1967_v39, %s1821_s24  ;;  %875 = vrot.lane.b32.xlu1 %v839_v42, %s1821_s24 }
 0x1d5   : >> { %869 = vrot.lane.b32.xlu0 %v1962_v37, %s1821_s24  ;;  %898 = vrot.lane.b32.xlu1 %v1969_v40, %s1822_s30 }
 0x1d9   : >> { %896 = vrot.lane.b32.xlu0 %v1967_v39, %s1822_s30  ;;  %900 = vrot.lane.b32.xlu1 %v839_v42, %s1822_s30 }
 0x1dd   : >> { %894 = vrot.lane.b32.xlu0 %v1962_v37, %s1822_s30  ;;  %923 = vrot.lane.b32.xlu1 %v1969_v40, %s1823_s6 }
 0x1e1   : >> { %921 = vrot.lane.b32.xlu0 %v1967_v39, %s1823_s6  ;;  %925 = vrot.lane.b32.xlu1 %v839_v42, %s1823_s6 }
 0x1e5   : >> { %919 = vrot.lane.b32.xlu0 %v1962_v37, %s1823_s6 }
 0x216   : >> { %v739_v45 = vpop.permute.xlu1 %738 }
 0x21b   : >> { %v741_v44 = vpop.permute.xlu0 %740  ;;  %v745_v47 = vpop.permute.xlu1 %744 }
 0x21c   : >> { %v746_v50 = vsel %vm260_vm1, %v739_v45, %v741_v44  ;;  %v1209_v45 = vld [vmem:[#allocation3 + $0x20] sm:$0xff] }
 0x21d   : >> { %1220 = vrot.lane.b32.xlu1 %v1209_v45, %s1820_s23 }
 0x21f   : >> { %v743_v46 = vpop.permute.xlu0 %742  ;;  %v768_v52 = vpop.permute.xlu1 %767 }
 0x220   : >> { %v747_v48 = vsel %vm260_vm1, %v741_v44, %v743_v46  ;;  %v748_v49 = vsel %vm260_vm1, %v743_v46, %v745_v47  ;;  %v1100_v44 = vld [vmem:[#allocation3] sm:$0xff]  ;;  %v1065_v46 = vld [vmem:[%s2203_s1] sm:$0x7] }
 0x221   : >> { %975 = vmatprep.subr.bf16.mxu0 %v747_v48  ;;  %1019 = vmatpush1.bf16.msra.mxu1 %v748_v49  ;;  %v1070_v47 = vrot.slane %v1065_v46, %v1950_v9 }
 0x222   : >> { %976 = vmatpush1.bf16.msra.mxu0 %v746_v50  ;;  %1020 = vmatprep.subr.bf16.mxu1 %v1816_v41  ;;  %v1074_v50 = vrot.slane %v1065_v46, %v1952_v10 }
 0x223   : >> { %v766_v51 = vpop.permute.xlu0 %765  ;;  %v770_v55 = vpop.permute.xlu1 %769  ;;  %1108 = vrot.lane.b32.xlu0 %v1100_v44, %s1815_s19 }
 0x224   : >> { %v772_v53 = vsel %vm298_vm2, %v766_v51, %v768_v52  ;;  %v773_v57 = vsel %vm298_vm2, %v768_v52, %v770_v55 }
 0x225   : >> { %977 = vmatprep.subr.bf16.mxu0 %v772_v53  ;;  %1021 = vmatpush1.bf16.msra.mxu1 %v773_v57  ;;  %v1078_v53 = vrot.slane %v1065_v46, %v1945_v7 }
 0x226   : >> { %1022 = vmatprep.subr.bf16.mxu1 %v1816_v41 }
 0x227   : >> { %v764_v54 = vpop.permute.xlu0 %763  ;;  %v793_v59 = vpop.permute.xlu1 %792  ;;  %1133 = vrot.lane.b32.xlu0 %v1100_v44, %s1817_s20 }
 0x228   : >> { %v771_v56 = vsel %vm298_vm2, %v764_v54, %v766_v51 }
 0x229   : >> { %978 = vmatpush1.bf16.msra.mxu0 %v771_v56 }
 0x22b   : >> { %v791_v58 = vpop.permute.xlu0 %790  ;;  %v795_v62 = vpop.permute.xlu1 %794  ;;  %1158 = vrot.lane.b32.xlu0 %v1100_v44, %s1818_s21 }
 0x22c   : >> { %v797_v60 = vsel %vm336_vm3, %v791_v58, %v793_v59  ;;  %v798_v1 = vsel %vm336_vm3, %v793_v59, %v795_v62 }
 0x22d   : >> { %979 = vmatprep.subr.bf16.mxu0 %v797_v60  ;;  %1023 = vmatpush1.bf16.msra.mxu1 %v798_v1 }
 0x22e   : >> { %1024 = vmatprep.subr.bf16.mxu1 %v1816_v41 }
 0x22f   : >> { %v789_v61 = vpop.permute.xlu0 %788  ;;  %v818_v3 = vpop.permute.xlu1 %817  ;;  %1183 = vrot.lane.b32.xlu0 %v1100_v44, %s1819_s22 }
 0x230   : >> { %v796_v63 = vsel %vm336_vm3, %v789_v61, %v791_v58 }
 0x231   : >> { %980 = vmatpush1.bf16.msra.mxu0 %v796_v63 }
 0x233   : >> { %v816_v2 = vpop.permute.xlu0 %815  ;;  %v820_v6 = vpop.permute.xlu1 %819 }
 0x234   : >> { %v822_v4 = vsel %vm374_vm4, %v816_v2, %v818_v3  ;;  %v823_v11 = vsel %vm374_vm4, %v818_v3, %v820_v6 }
 0x235   : >> { %981 = vmatprep.subr.bf16.mxu0 %v822_v4  ;;  %1025 = vmatpush1.bf16.msra.mxu1 %v823_v11 }
 0x236   : >> { %1026 = vmatprep.subr.bf16.mxu1 %v1816_v41 }
 0x237   : >> { %v814_v5 = vpop.permute.xlu0 %813  ;;  %v849_v13 = vpop.permute.xlu1 %848 }
 0x238   : >> { %v821_v8 = vsel %vm374_vm4, %v814_v5, %v816_v2 }
 0x239   : >> { %982 = vmatpush1.bf16.msra.mxu0 %v821_v8  ;;  %1027 = vmatpush1.bf16.msra.mxu1 %v1969_v40 }
 0x23a   : >> { %983 = vmatprep.subr.bf16.mxu0 %v1967_v39  ;;  %1028 = vmatprep.subr.bf16.mxu1 %v1816_v41 }
 0x23b   : >> { %v847_v12 = vpop.permute.xlu0 %846  ;;  %v851_v16 = vpop.permute.xlu1 %850 }
 0x23c   : >> { %v853_v14 = vsel %vm435_vm5, %v847_v12, %v849_v13  ;;  %v854_v18 = vsel %vm435_vm5, %v849_v13, %v851_v16  ;;  %v1783_v13 = vld [vmem:[%s2015_s29 + $0x14] ss:$8 sps:$4 sm:$0xff]  }
 0x23d   : >> { %984 = vmatpush1.bf16.msra.mxu0 %v1962_v37  ;;  %1029 = vmatpush1.bf16.msra.mxu1 %v854_v18 }
 0x23e   : >> { %985 = vmatprep.subr.bf16.mxu0 %v853_v14  ;;  %1030 = vmatprep.subr.bf16.mxu1 %v1816_v41 }
 0x23f   : >> { %v845_v15 = vpop.permute.xlu0 %844  ;;  %v874_v20 = vpop.permute.xlu1 %873 }
 0x240   : >> { %v852_v17 = vsel %vm435_vm5, %v845_v15, %v847_v12 }
 0x241   : >> { %986 = vmatpush1.bf16.msra.mxu0 %v852_v17 }
 0x243   : >> { %v872_v19 = vpop.permute.xlu0 %871  ;;  %v876_v23 = vpop.permute.xlu1 %875 }
 0x244   : >> { %v878_v21 = vsel %vm473_vm6, %v872_v19, %v874_v20  ;;  %v879_v25 = vsel %vm473_vm6, %v874_v20, %v876_v23 }
 0x245   : >> { %987 = vmatprep.subr.bf16.mxu0 %v878_v21  ;;  %1031 = vmatpush1.bf16.msra.mxu1 %v879_v25 }
 0x246   : >> { %1032 = vmatprep.subr.bf16.mxu1 %v1816_v41 }
 0x247   : >> { %v870_v22 = vpop.permute.xlu0 %869  ;;  %v899_v27 = vpop.permute.xlu1 %898 }
 0x248   : >> { %v877_v24 = vsel %vm473_vm6, %v870_v22, %v872_v19 }
 0x249   : >> { %988 = vmatpush1.bf16.msra.mxu0 %v877_v24 }
 0x24b   : >> { %v897_v26 = vpop.permute.xlu0 %896  ;;  %v901_v30 = vpop.permute.xlu1 %900 }
 0x24c   : >> { %v903_v28 = vsel %vm511_vm7, %v897_v26, %v899_v27  ;;  %v904_v32 = vsel %vm511_vm7, %v899_v27, %v901_v30 }
 0x24d   : >> { %989 = vmatprep.subr.bf16.mxu0 %v903_v28  ;;  %1033 = vmatpush1.bf16.msra.mxu1 %v904_v32 }
 0x24e   : >> { %1034 = vmatprep.subr.bf16.mxu1 %v1816_v41 }
 0x24f   : >> { %v895_v29 = vpop.permute.xlu0 %894  ;;  %v924_v34 = vpop.permute.xlu1 %923 }
 0x250   : >> { %v902_v31 = vsel %vm511_vm7, %v895_v29, %v897_v26 }
 0x251   : >> { %990 = vmatpush1.bf16.msra.mxu0 %v902_v31 }
 0x253   : >> { %v922_v33 = vpop.permute.xlu0 %921  ;;  %v926_v38 = vpop.permute.xlu1 %925 }
 0x254   : >> { %v928_v35 = vsel %vm549_vm8, %v922_v33, %v924_v34  ;;  %v929_v42 = vsel %vm549_vm8, %v924_v34, %v926_v38 }
 0x255   : >> { %991 = vmatprep.subr.bf16.mxu0 %v928_v35  ;;  %1035 = vmatpush1.bf16.msra.mxu1 %v929_v42 }
 0x256   : >> { %1388 = vmatprep.subr.bf16.mxu1 %v1816_v41 }
 0x257   : >> { %v920_v36 = vpop.permute.xlu0 %919 }
 0x258   : >> { %v927_v40 = vsel %vm549_vm8, %v920_v36, %v922_v33  ;;  %1051 = vmatmul.mubr.bf16.vlgmr.msra.gmra.mrb[0].mxu1 %v1778_v43 }
 0x259   : >> { %992 = vmatpush1.bf16.msra.mxu0 %v927_v40  ;;  %1708 = vmatprep.mubr.msk.bf16.mxu1 %vm595_vm0, %v1783_v13 }
 0x25c   : >> { %1008 = vmatmul.mubr.bf16.vlgmr.msra.gmra.mrb[0].mxu0 %v1778_v43 }
 0x25d   : >> { %1707 = vmatprep.mubr.msk.bf16.mxu0 %vm595_vm0, %v1783_v13 }
 0x28f   : >> { %v1221_v18 = vpop.permute.xlu1 %1220 }
 0x295   : >> { %v1109_v14 = vpop.permute.xlu0 %1108 }
 0x299   : >> { %v1134_v15 = vpop.permute.xlu0 %1133 }
 0x29d   : >> { %v1159_v16 = vpop.permute.xlu0 %1158 }
 0x2a1   : >> { %v1184_v17 = vpop.permute.xlu0 %1183 }
 0x32b   : >> { %v1052_v49 = vpop.f32.mrb[0].mxu1 }
 0x32c   : >> { %v1061_v52 = vmax.f32 %v1052_v49, 0.0  ;;  %v1054_v55 = vpop.f32.mrb[1].mxu1 }
 0x32d   : >> { %v1055_v58 = vpop.f32.mrb[2].mxu1 }
 0x32e   : >> { %v1064_v61 = vmax.f32 %v1055_v58, 0.0  ;;  %v1057_v62 = vpop.f32.mrb[3].mxu1  ;;  %v1084_v3 = vmul.f32 %v1078_v53, %v1061_v52 }
 0x32f   : >> { %v1009_v48 = vpop.f32.mrb[0].mxu0 }
 0x330   : >> { %v1059_v51 = vmax.f32 %v1009_v48, 0.0  ;;  %v1011_v54 = vpop.f32.mrb[1].mxu0  ;;  %v1087_v5 = vmul.f32 %v1078_v53, %v1064_v61 }
 0x331   : >> { %v1060_v56 = vmax.f32 %v1011_v54, 0.0  ;;  %v1013_v57 = vpop.f32.mrb[2].mxu0 }
 0x332   : >> { %v1082_v59 = vmul.f32 %v1070_v47, %v1059_v51  ;;  %v1062_v60 = vmax.f32 %v1013_v57, 0.0  ;;  %v1015_v63 = vpop.f32.mrb[3].mxu0  ;;  %v2084_v11 = vpack.c.bf16 %v1087_v5, %v1084_v3 }
 0x333   : >> { %v1083_v1 = vmul.f32 %v1074_v50, %v1060_v56  ;;  %v1063_v2 = vmax.f32 %v1015_v63, 0.0 }
 0x334   : >> { %v1085_v4 = vmul.f32 %v1070_v47, %v1062_v60  ;;  %1114 = vrot.lane.b32.xlu1 %v2084_v11, %s1815_s19 }
 0x335   : >> { %v1086_v6 = vmul.f32 %v1074_v50, %v1063_v2 }
 0x336   : >> { %v2082_v8 = vpack.c.bf16 %v1085_v4, %v1082_v59 }
 0x337   : >> { %v2086_v12 = vpack.c.bf16 %v1086_v6, %v1083_v1 }
 0x338   : >> { %1110 = vrot.lane.b32.xlu0 %v2082_v8, %s1815_s19  ;;  %1139 = vrot.lane.b32.xlu1 %v2084_v11, %s1817_s20 }
 0x33c   : >> { %1135 = vrot.lane.b32.xlu0 %v2082_v8, %s1817_s20  ;;  %1164 = vrot.lane.b32.xlu1 %v2084_v11, %s1818_s21 }
 0x340   : >> { %1160 = vrot.lane.b32.xlu0 %v2082_v8, %s1818_s21  ;;  %1189 = vrot.lane.b32.xlu1 %v2084_v11, %s1819_s22 }
 0x344   : >> { %1185 = vrot.lane.b32.xlu0 %v2082_v8, %s1819_s22  ;;  %1218 = vrot.lane.b32.xlu1 %v2084_v11, %s1820_s23 }
 0x348   : >> { %1214 = vrot.lane.b32.xlu0 %v2082_v8, %s1820_s23  ;;  %1112 = vrot.lane.b32.xlu1 %v2086_v12, %s1815_s19 }
 0x34c   : >> { %1239 = vrot.lane.b32.xlu0 %v2082_v8, %s1821_s24  ;;  %1137 = vrot.lane.b32.xlu1 %v2086_v12, %s1817_s20 }
 0x350   : >> { %1264 = vrot.lane.b32.xlu0 %v2082_v8, %s1822_s30  ;;  %1162 = vrot.lane.b32.xlu1 %v2086_v12, %s1818_s21 }
 0x354   : >> { %1216 = vrot.lane.b32.xlu0 %v2086_v12, %s1820_s23  ;;  %1187 = vrot.lane.b32.xlu1 %v2086_v12, %s1819_s22 }
 0x358   : >> { %1241 = vrot.lane.b32.xlu0 %v2086_v12, %s1821_s24  ;;  %1243 = vrot.lane.b32.xlu1 %v2084_v11, %s1821_s24 }
 0x35c   : >> { %1266 = vrot.lane.b32.xlu0 %v2086_v12, %s1822_s30  ;;  %1245 = vrot.lane.b32.xlu1 %v1209_v45, %s1821_s24 }
 0x360   : >> { %1291 = vrot.lane.b32.xlu0 %v2086_v12, %s1823_s6  ;;  %1268 = vrot.lane.b32.xlu1 %v2084_v11, %s1822_s30 }
 0x364   : >> { %1289 = vrot.lane.b32.xlu0 %v2082_v8, %s1823_s6  ;;  %1270 = vrot.lane.b32.xlu1 %v1209_v45, %s1822_s30 }
 0x368   : >> { %1293 = vrot.lane.b32.xlu1 %v2084_v11, %s1823_s6 }
 0x36c   : >> { %1295 = vrot.lane.b32.xlu1 %v1209_v45, %s1823_s6 }
 0x3a6   : >> { %v1115_v19 = vpop.permute.xlu1 %1114 }
 0x3aa   : >> { %v1111_v20 = vpop.permute.xlu0 %1110  ;;  %v1140_v22 = vpop.permute.xlu1 %1139 }
 0x3ab   : >> { %v1116_v21 = vsel %vm260_vm1, %v1109_v14, %v1111_v20  ;;  %v1435_v14 = vld [vmem:[%s2203_s1] sm:$0x7] }
 0x3ae   : >> { %v1136_v23 = vpop.permute.xlu0 %1135  ;;  %v1165_v25 = vpop.permute.xlu1 %1164 }
 0x3af   : >> { %v1141_v24 = vsel %vm298_vm2, %v1134_v15, %v1136_v23  ;;  %v1440_v15 = vrot.slane %v1435_v14, %v1950_v9 }
 0x3b2   : >> { %v1161_v26 = vpop.permute.xlu0 %1160  ;;  %v1190_v28 = vpop.permute.xlu1 %1189 }
 0x3b3   : >> { %v1166_v27 = vsel %vm336_vm3, %v1159_v16, %v1161_v26 }
 0x3b6   : >> { %v1186_v29 = vpop.permute.xlu0 %1185  ;;  %v1219_v31 = vpop.permute.xlu1 %1218 }
 0x3b7   : >> { %v1191_v30 = vsel %vm374_vm4, %v1184_v17, %v1186_v29  ;;  %v1224_v33 = vsel %vm435_vm5, %v1219_v31, %v1221_v18  ;;  %v1461_v18 = vunpack.c.l.bf16 %v1962_v37 }
 0x3ba   : >> { %v1215_v32 = vpop.permute.xlu0 %1214  ;;  %v1113_v35 = vpop.permute.xlu1 %1112 }
 0x3bb   : >> { %v1117_v36 = vsel %vm260_vm1, %v1111_v20, %v1113_v35  ;;  %v1118_v38 = vsel %vm260_vm1, %v1113_v35, %v1115_v19  ;;  %v1460_v20 = vld [vmem:[#allocation2 + $0x18] sm:$0xff] }
 0x3bc   : >> { %1345 = vmatprep.subr.bf16.mxu0 %v1117_v36  ;;  %1389 = vmatpush1.bf16.msra.mxu1 %v1118_v38 }
 0x3bd   : >> { %1346 = vmatpush1.bf16.msra.mxu0 %v1116_v21  ;;  %1390 = vmatprep.subr.bf16.mxu1 %v1816_v41 }
 0x3be   : >> { %v1240_v34 = vpop.permute.xlu0 %1239  ;;  %v1138_v42 = vpop.permute.xlu1 %1137 }
 0x3bf   : >> { %v1142_v43 = vsel %vm298_vm2, %v1136_v23, %v1138_v42  ;;  %v1143_v44 = vsel %vm298_vm2, %v1138_v42, %v1140_v22  ;;  %v1462_v22 = vunpack.c.l.bf16 %v1967_v39  ;;  %v1466_v42 = vunpack.c.h.bf16 %v1460_v20 }
 0x3c0   : >> { %1347 = vmatprep.subr.bf16.mxu0 %v1142_v43  ;;  %1391 = vmatpush1.bf16.msra.mxu1 %v1143_v44 }
 0x3c1   : >> { %1348 = vmatpush1.bf16.msra.mxu0 %v1141_v24  ;;  %1392 = vmatprep.subr.bf16.mxu1 %v1816_v41  ;;  %v1448_v24 = vrot.slane %v1435_v14, %v1945_v7 }
 0x3c2   : >> { %v1265_v40 = vpop.permute.xlu0 %1264  ;;  %v1163_v46 = vpop.permute.xlu1 %1162 }
 0x3c3   : >> { %v1167_v49 = vsel %vm336_vm3, %v1161_v26, %v1163_v46  ;;  %v1168_v50 = vsel %vm336_vm3, %v1163_v46, %v1165_v25 }
 0x3c4   : >> { %1349 = vmatprep.subr.bf16.mxu0 %v1167_v49  ;;  %1393 = vmatpush1.bf16.msra.mxu1 %v1168_v50 }
 0x3c5   : >> { %1350 = vmatpush1.bf16.msra.mxu0 %v1166_v27  ;;  %1394 = vmatprep.subr.bf16.mxu1 %v1816_v41  ;;  %v1464_v27 = vunpack.c.h.bf16 %v1962_v37 }
 0x3c6   : >> { %v1217_v45 = vpop.permute.xlu0 %1216  ;;  %v1188_v52 = vpop.permute.xlu1 %1187 }
 0x3c7   : >> { %v1222_v47 = vsel %vm435_vm5, %v1215_v32, %v1217_v45  ;;  %v1223_v48 = vsel %vm435_vm5, %v1217_v45, %v1219_v31  ;;  %v1192_v54 = vsel %vm374_vm4, %v1186_v29, %v1188_v52  ;;  %v1193_v55 = vsel %vm374_vm4, %v1188_v52, %v1190_v28 }
 0x3c8   : >> { %1351 = vmatprep.subr.bf16.mxu0 %v1192_v54  ;;  %1395 = vmatpush1.bf16.msra.mxu1 %v1193_v55  ;;  %v1465_v29 = vunpack.c.h.bf16 %v1967_v39 }
 0x3c9   : >> { %1352 = vmatpush1.bf16.msra.mxu0 %v1191_v30  ;;  %1396 = vmatprep.subr.bf16.mxu1 %v1816_v41 }
 0x3ca   : >> { %v1242_v51 = vpop.permute.xlu0 %1241  ;;  %v1244_v57 = vpop.permute.xlu1 %1243  ;;  %1353 = vmatprep.subr.bf16.mxu0 %v2086_v12 }
 0x3cb   : >> { %v1247_v53 = vsel %vm473_vm6, %v1240_v34, %v1242_v51  ;;  %v1248_v59 = vsel %vm473_vm6, %v1242_v51, %v1244_v57  ;;  %v1463_v34 = vunpack.c.l.bf16 %v1460_v20 }
 0x3cc   : >> { %1397 = vmatpush1.bf16.msra.mxu1 %v2084_v11  ;;  %v1781_v11 = vld [vmem:[%s2015_s29 + $0x10] ss:$8 sps:$4 sm:$0xff]  }
 0x3cd   : >> { %1354 = vmatpush1.bf16.msra.mxu0 %v2082_v8  ;;  %1398 = vmatprep.subr.bf16.mxu1 %v1816_v41 }
 0x3ce   : >> { %v1267_v56 = vpop.permute.xlu0 %1266  ;;  %v1246_v61 = vpop.permute.xlu1 %1245  ;;  %1355 = vmatprep.subr.bf16.mxu0 %v1223_v48 }
 0x3cf   : >> { %v1272_v58 = vsel %vm511_vm7, %v1265_v40, %v1267_v56  ;;  %v1249_v62 = vsel %vm473_vm6, %v1244_v57, %v1246_v61 }
 0x3d0   : >> { %1399 = vmatpush1.bf16.msra.mxu1 %v1224_v33 }
 0x3d1   : >> { %1356 = vmatpush1.bf16.msra.mxu0 %v1222_v47  ;;  %1400 = vmatprep.subr.bf16.mxu1 %v1816_v41 }
 0x3d2   : >> { %v1292_v60 = vpop.permute.xlu0 %1291  ;;  %v1269_v1 = vpop.permute.xlu1 %1268  ;;  %1357 = vmatprep.subr.bf16.mxu0 %v1248_v59 }
 0x3d3   : >> { %v1273_v3 = vsel %vm511_vm7, %v1267_v56, %v1269_v1 }
 0x3d4   : >> { %1401 = vmatpush1.bf16.msra.mxu1 %v1249_v62 }
 0x3d5   : >> { %1358 = vmatpush1.bf16.msra.mxu0 %v1247_v53  ;;  %1402 = vmatprep.subr.bf16.mxu1 %v1816_v41 }
 0x3d6   : >> { %v1290_v63 = vpop.permute.xlu0 %1289  ;;  %v1271_v4 = vpop.permute.xlu1 %1270  ;;  %1359 = vmatprep.subr.bf16.mxu0 %v1273_v3 }
 0x3d7   : >> { %v1297_v2 = vsel %vm549_vm8, %v1290_v63, %v1292_v60  ;;  %v1274_v5 = vsel %vm511_vm7, %v1269_v1, %v1271_v4  ;;  %v1824_v63 = vmov (%p720_p4), 0.0   ;;  %v1485_v1 = vld [vmem:[%s2206_s4] sm:$0x3] (%p720_p4) }
 0x3d8   : >> { %1403 = vmatpush1.bf16.msra.mxu1 %v1274_v5 }
 0x3d9   : >> { %1360 = vmatpush1.bf16.msra.mxu0 %v1272_v58  ;;  %1404 = vmatprep.subr.bf16.mxu1 %v1816_v41  ;;  %v1444_v41 = vrot.slane %v1435_v14, %v1952_v10 }
 0x3da   : >> { %v1294_v6 = vpop.permute.xlu1 %1293 }
 0x3db   : >> { %v1298_v8 = vsel %vm549_vm8, %v1292_v60, %v1294_v6 }
 0x3dc   : >> { %1361 = vmatprep.subr.bf16.mxu0 %v1298_v8 }
 0x3dd   : >> { %1362 = vmatpush1.bf16.msra.mxu0 %v1297_v2 }
 0x3de   : >> { %v1296_v12 = vpop.permute.xlu1 %1295 }
 0x3df   : >> { %v1299_v13 = vsel %vm549_vm8, %v1294_v6, %v1296_v12 }
 0x3e0   : >> { %1378 = vmatmul.mubr.bf16.vlgmr.msra.gmra.mrb[4].mxu0 %v1781_v11  ;;  %1405 = vmatpush1.bf16.msra.mxu1 %v1299_v13 }
 0x3e1   : > { %1524 = vmatprep.mubr.bf16.mxu0 (%p720_p4), %v1806_v0  ;;  %1718 = vmatprep.subr.bf16.mxu1 (%p720_p4), %v1824_v63 }
 0x3e3   : >> { %1421 = vmatmul.mubr.bf16.vlgmr.msra.gmra.mrb[4].mxu1 %v1781_v11 }
 0x3e4   : > { %1720 = vmatprep.mubr.msk.bf16.mxu1 (%p720_p4), %vm1825_vm9, %v1824_v63 }
 0x4b3   : >> { %v1379_v16 = vpop.f32.mrb[4].mxu0 }
 0x4b4   : >> { %v1429_v17 = vmax.f32 %v1379_v16, 0.0  ;;  %v1381_v19 = vpop.f32.mrb[5].mxu0 }
 0x4b5   : >> { %v1430_v21 = vmax.f32 %v1381_v19, 0.0  ;;  %v1383_v23 = vpop.f32.mrb[6].mxu0 }
 0x4b6   : >> { %v1452_v25 = vmul.f32 %v1440_v15, %v1429_v17  ;;  %v1432_v26 = vmax.f32 %v1383_v23, 0.0  ;;  %v1385_v28 = vpop.f32.mrb[7].mxu0  ;;  %v1422_v30 = vpop.f32.mrb[4].mxu1 }
 0x4b7   : >> { %v1453_v31 = vmul.f32 %v1444_v41, %v1430_v21  ;;  %v1433_v32 = vmax.f32 %v1385_v28, 0.0  ;;  %v1431_v33 = vmax.f32 %v1422_v30, 0.0  ;;  %v1424_v35 = vpop.f32.mrb[5].mxu1 }
 0x4b8   : >> { %v1467_v36 = vadd.f32 %v1461_v18, %v1452_v25  ;;  %v1455_v38 = vmul.f32 %v1440_v15, %v1432_v26  ;;  %v1425_v40 = vpop.f32.mrb[6].mxu1 }
 0x4b9   : >> { %v1468_v43 = vadd.f32 %v1462_v22, %v1453_v31  ;;  %v1456_v44 = vmul.f32 %v1444_v41, %v1433_v32  ;;  %v1454_v45 = vmul.f32 %v1448_v24, %v1431_v33  ;;  %v1434_v46 = vmax.f32 %v1425_v40, 0.0  ;;  %v1427_v47 = vpop.f32.mrb[7].mxu1 }
 0x4ba   : >> { %v1473_v48 = vmax.f32 %v1467_v36, 0.0  ;;  %v1470_v37 = vadd.f32 %v1464_v27, %v1455_v38 }
 0x4bb   : >> { %v1474_v49 = vmax.f32 %v1468_v43, 0.0  ;;  %v1471_v50 = vadd.f32 %v1465_v29, %v1456_v44  ;;  %v1469_v39 = vadd.f32 %v1463_v34, %v1454_v45  ;;  %v1457_v51 = vmul.f32 %v1448_v24, %v1434_v46 }
 0x4bc   : >> { %v1476_v52 = vmax.f32 %v1470_v37, 0.0 }
 0x4bd   : >> { %v1477_v53 = vmax.f32 %v1471_v50, 0.0  ;;  %v1472_v54 = vadd.f32 %v1466_v42, %v1457_v51  ;;  %v1475_v57 = vmax.f32 %v1469_v39, 0.0  ;;  %722 = sbr.rel (!%p720_p4) target bundleno = 419 (0x1a3), region = 79 }
 0x4be   : >> { %v1479_v55 = vpack.c.bf16 %v1476_v52, %v1473_v48 }
 0x4bf   : >> { %v1480_v56 = vpack.c.bf16 %v1477_v53, %v1474_v49  ;;  %v1478_v58 = vmax.f32 %v1472_v54, 0.0 }
 0x4c0   : >> { %1482 = vst [vmem:[#allocation2 + $0x8] sm:$0xff] %v1479_v55 }
 0x4c1   : >> { %1483 = vst [vmem:[#allocation2 + $0x10] sm:$0xff] %v1480_v56  ;;  %v1481_v59 = vpack.c.bf16 %v1478_v58, %v1475_v57 }
 0x4c3   : >> { %1484 = vst [vmem:[#allocation2 + $0x18] sm:$0xff] %v1481_v59 }
 0x4c7   : > { %v1486_v61 = vld [vmem:[#allocation2 + $0x8] sm:$0xff] }
 0x4c8   : > { %v1487_v60 = vld [vmem:[#allocation2 + $0x10] sm:$0xff] }
 0x4c9   : > { %1492 = vmatprep.subr.bf16.mxu0 %v1487_v60 }
 0x4ca   : > { %v1488_v62 = vld [vmem:[#allocation2 + $0x18] sm:$0xff]  ;;  %1493 = vmatpush1.bf16.msra.mxu0 %v1486_v61 }
 0x4cb   : > { %1719 = vmatpush3.bf16.msra.mxu1 %v1488_v62 }
 0x4cd   : > { %1709 = vmatmul.mubr.msk.bf16.vlgmr.msra.gmra.mrb[0].mxu0 %vm595_vm0, %v1485_v1 }
 0x4ce   : > { %1721 = vmatmul.mubr.msk.bf16.vlgmr.msra.gmra.mrb[0].mxu1 %vm595_vm0, %v1485_v1 }
 0x5a0   : > { %v1526_v7 = vpop.f32.mrb[0].mxu0 }
 0x5a1   : > { %v1567_v9 = vpop.f32.mrb[0].mxu1  ;;  %1784 = vtanh.f32 %v1526_v7  ;;  %v1528_v0 = vpop.f32.mrb[1].mxu0 }
 0x5a2   : > { %v1722_v10 = vpop.f32.mrb[1].mxu1  ;;  %1786 = vtanh.f32 %v1567_v9  ;;  %v1530_v2 = vpop.f32.mrb[2].mxu0 }
 0x5a3   : > { %v1570_v3 = vpop.f32.mrb[2].mxu1  ;;  %1788 = vtanh.f32 %v1528_v0  ;;  %v1531_v4 = vpop.f32.mrb[3].mxu0 }
 0x5a4   : > { %v1723_v5 = vpop.f32.mrb[3].mxu1 }
 0x5ab   : > { %v1785_v6 = vpop.eup %1784 }
 0x5ac   : > { %v1787_v8 = vpop.eup %1786 }
 0x5ad   : > { %v1789_v11 = vpop.eup %1788  ;;  %1581 = vst [vmem:[%s1877_s27 + $0x8] sm:$0xf] %v1787_v8 }
 0x5ae   : > { %v1578_v12 = vcombine.low %v1785_v6, %v1789_v11 }
 0x5b0   : > { %1580 = vst [vmem:[%s1877_s27] sm:$0xff] %v1578_v12 }
 0x5b1 PF: > { %s15_s18 = sadd.s32 1, %s1800_s18  }
 0x5b2   : > { %p12_p5 = scmp.ge.s32.totalorder %s15_s18, 4  }
 0x5b4   :  { %14 = sbr.rel (!%p12_p5) target bundleno = 1 (0x1), region = 90 }

</bundles_post_ra>
